<compile_context>
chip_gen: v7x
topology: tpu7x:2x2x1
jax: 0.10.0
libtpu: 0.0.40
codegen_flags: <defaults>
</compile_context>

<pallas_src>
import math

import jax
import jax.numpy as jnp
from jax.experimental import pallas as pl
from jax.experimental.pallas import tpu as pltpu

# ----------------------------- model config ---------------------------------
VOCAB = 256
HIDDEN = 128
N_HEADS = 4
HEAD_DIM = HIDDEN // N_HEADS          # 32
N_LAYERS = 2
FFN = 256
NUM_LABELS = 1                        # reward model -> single score -> squeeze(-1)
RMS_EPS = 1e-5
ROPE_BASE = 10000.0
NEG_INF = -1e9                        # additive mask stays in f32


# ----------------------------- Pallas kernel ---------------------------------
def _rmsnorm(x, w):
    # x: (S, H) f32, w: (1, H) f32 -- statistics kept in f32
    var = jnp.mean(x * x, axis=-1, keepdims=True)
    return x * jax.lax.rsqrt(var + RMS_EPS) * w


def _reward_fwd_kernel(x_ref, mask_ref, attn_norm_ref, wqkv_ref, wo_ref,
                       mlp_norm_ref, wgu_ref, wd_ref, fnorm_ref, score_ref,
                       cos_ref, sin_ref, o_ref):
    """One grid step == one batch element; whole transformer forward in VMEM."""
    S = x_ref.shape[1]
    H = x_ref.shape[2]
    half = HEAD_DIM // 2
    scale = 1.0 / math.sqrt(HEAD_DIM)

    x = x_ref[0]                                    # (S, H) f32 residual stream
    msk = mask_ref[0]                               # (1, S) f32 {0,1}

    # additive attention mask built in-kernel: causal AND key-not-padded (f32)
    row = jax.lax.broadcasted_iota(jnp.int32, (S, S), 0)
    col = jax.lax.broadcasted_iota(jnp.int32, (S, S), 1)
    keep = (col <= row) & (msk > 0.5)               # (S, S)
    add_mask = jnp.where(keep, 0.0, NEG_INF)

    # RoPE (rotate-half) applied per 32-lane head block using two lane rolls.
    cos_f = cos_ref[...]                            # (S, H)
    sin_f = sin_ref[...]                            # (S, H), rotate-half sign folded in
    lane = jax.lax.broadcasted_iota(jnp.int32, (S, H), 1)
    first_half = (lane % HEAD_DIM) < half

    def rope(t):
        partner = jnp.where(first_half,
                            pltpu.roll(t, H - half, axis=1),   # t[:, lane + half]
                            pltpu.roll(t, half, axis=1))       # t[:, lane - half]
        return t * cos_f + partner * sin_f

    for li in range(N_LAYERS):
        # ---- attention block: rmsnorm -> fused QKV -> RoPE -> MHA -> wo -> +resid
        h = _rmsnorm(x, attn_norm_ref[li])
        qkv = jnp.dot(h.astype(jnp.bfloat16), wqkv_ref[li],
                      preferred_element_type=jnp.float32)      # (S, 3H) f32 acc
        q = rope(qkv[:, 0:H])
        k = rope(qkv[:, H:2 * H])
        v = qkv[:, 2 * H:3 * H]

        heads = []
        for hh in range(N_HEADS):
            sl = slice(hh * HEAD_DIM, (hh + 1) * HEAD_DIM)
            qh = q[:, sl].astype(jnp.bfloat16)
            kh = k[:, sl].astype(jnp.bfloat16)
            vh = v[:, sl].astype(jnp.bfloat16)
            s = jnp.einsum('qd,kd->qk', qh, kh,
                           preferred_element_type=jnp.float32) * scale + add_mask
            m = jnp.max(s, axis=-1, keepdims=True)             # softmax in f32
            p = jnp.exp(s - m)
            p = p * pl.reciprocal(jnp.sum(p, axis=-1, keepdims=True), approx=True)
            heads.append(jnp.einsum('qk,kd->qd', p.astype(jnp.bfloat16), vh,
                                    preferred_element_type=jnp.float32))
        attn = jnp.concatenate(heads, axis=-1)                 # (S, H) f32
        x = x + jnp.dot(attn.astype(jnp.bfloat16), wo_ref[li],
                        preferred_element_type=jnp.float32)

        # ---- MLP block: rmsnorm -> fused gate/up -> SwiGLU -> down -> +resid
        h = _rmsnorm(x, mlp_norm_ref[li])
        gu = jnp.dot(h.astype(jnp.bfloat16), wgu_ref[li],
                     preferred_element_type=jnp.float32)       # (S, 2F)
        g = gu[:, :FFN]
        u = gu[:, FFN:]
        act = g * jax.lax.logistic(g) * u                      # SiLU(g) * up, f32
        x = x + jnp.dot(act.astype(jnp.bfloat16), wd_ref[li],
                        preferred_element_type=jnp.float32)

    # ---- final norm, last-non-pad-token pooling (one-hot select), score head ----
    hfin = _rmsnorm(x, fnorm_ref[...])                         # (S, H)
    last_idx = jnp.sum(msk, axis=1, keepdims=True) - 1.0       # (1, 1)
    pos = jax.lax.broadcasted_iota(jnp.int32, (S, 1), 0).astype(jnp.float32)
    sel = jnp.where(pos == last_idx, 1.0, 0.0)                 # (S, 1) one-hot
    pooled = jnp.sum(hfin * sel, axis=0, keepdims=True)        # (1, H)
    scores = jnp.dot(pooled, score_ref[...],
                     preferred_element_type=jnp.float32)       # (1, num_labels)
    o_ref[...] = scores[None]                                  # (1, 1, num_labels)


# ----------------------------- wrapper / params -------------------------------
def rope_tables(seq, head_dim, n_heads):
    """cos/sin tables tiled to the head-contiguous (S, H) lane layout.

    The rotate-half sign is folded into sin so the kernel only needs
    `x * cos + partner * sin`.
    """
    inv_freq = 1.0 / (ROPE_BASE ** (jnp.arange(0, head_dim, 2, dtype=jnp.float32) / head_dim))
    t = jnp.arange(seq, dtype=jnp.float32)
    freqs = jnp.outer(t, inv_freq)                             # (S, D/2)
    emb = jnp.concatenate([freqs, freqs], axis=-1)             # (S, D)
    cos = jnp.cos(emb)
    sin = jnp.sin(emb)
    sign = jnp.concatenate([-jnp.ones((1, head_dim // 2), jnp.float32),
                            jnp.ones((1, head_dim // 2), jnp.float32)], axis=-1)
    cos_full = jnp.tile(cos, (1, n_heads))                     # (S, H)
    sin_full = jnp.tile(sin * sign, (1, n_heads))              # (S, H)
    return cos_full, sin_full


def init_params(key):
    def dense(k, shape, dtype=jnp.float32):
        return (0.02 * jax.random.normal(k, shape, dtype=jnp.float32)).astype(dtype)

    keys = jax.random.split(key, 2 + N_LAYERS)
    qkvs, wos, gus, wds = [], [], [], []
    for li in range(N_LAYERS):
        lk = jax.random.split(keys[2 + li], 4)
        qkvs.append(dense(lk[0], (HIDDEN, 3 * HIDDEN), jnp.bfloat16))   # fused q/k/v
        wos.append(dense(lk[1], (HIDDEN, HIDDEN), jnp.bfloat16))
        gus.append(dense(lk[2], (HIDDEN, 2 * FFN), jnp.bfloat16))       # fused gate/up
        wds.append(dense(lk[3], (FFN, HIDDEN), jnp.bfloat16))
    return {
        "embed": dense(keys[0], (VOCAB, HIDDEN)),
        "attn_norm": jnp.ones((N_LAYERS, 1, HIDDEN), jnp.float32),
        "mlp_norm": jnp.ones((N_LAYERS, 1, HIDDEN), jnp.float32),
        "final_norm": jnp.ones((1, HIDDEN), jnp.float32),
        "score": dense(keys[1], (HIDDEN, NUM_LABELS)),          # Linear(H, num_labels, bias=False)
        "wqkv": jnp.stack(qkvs),                                # (L, H, 3H) bf16
        "wo": jnp.stack(wos),                                   # (L, H, H)  bf16
        "wgu": jnp.stack(gus),                                  # (L, H, 2F) bf16
        "wd": jnp.stack(wds),                                   # (L, F, H)  bf16
    }


@jax.jit
def _forward(params, input_ids, attention_mask):
    B, S = input_ids.shape
    H, F, L = HIDDEN, FFN, N_LAYERS

    # embedding lookup (gather) -- glue, stays in plain JAX
    x0 = params["embed"][input_ids]                            # (B, S, H) f32
    mask_f = attention_mask.astype(jnp.float32).reshape(B, 1, S)
    cos_f, sin_f = rope_tables(S, HEAD_DIM, N_HEADS)

    scores3 = pl.pallas_call(
        _reward_fwd_kernel,
        out_shape=jax.ShapeDtypeStruct((B, 1, NUM_LABELS), jnp.float32),
        grid=(B,),
        in_specs=[
            pl.BlockSpec((1, S, H), lambda b: (b, 0, 0)),       # token activations
            pl.BlockSpec((1, 1, S), lambda b: (b, 0, 0)),       # attention_mask row
            pl.BlockSpec((L, 1, H), lambda b: (0, 0, 0)),       # attn RMSNorm weights
            pl.BlockSpec((L, H, 3 * H), lambda b: (0, 0, 0)),   # fused wqkv (bf16)
            pl.BlockSpec((L, H, H), lambda b: (0, 0, 0)),       # wo (bf16)
            pl.BlockSpec((L, 1, H), lambda b: (0, 0, 0)),       # mlp RMSNorm weights
            pl.BlockSpec((L, H, 2 * F), lambda b: (0, 0, 0)),   # fused gate/up (bf16)
            pl.BlockSpec((L, F, H), lambda b: (0, 0, 0)),       # wd (bf16)
            pl.BlockSpec((1, H), lambda b: (0, 0)),             # final norm
            pl.BlockSpec((H, NUM_LABELS), lambda b: (0, 0)),    # score head
            pl.BlockSpec((S, H), lambda b: (0, 0)),             # RoPE cos
            pl.BlockSpec((S, H), lambda b: (0, 0)),             # RoPE sin (signed)
        ],
        out_specs=pl.BlockSpec((1, 1, NUM_LABELS), lambda b: (b, 0, 0)),
        compiler_params=pltpu.CompilerParams(
            dimension_semantics=("parallel",)),                 # v7x: shard batch across TCs
    )(x0, mask_f, params["attn_norm"], params["wqkv"], params["wo"],
      params["mlp_norm"], params["wgu"], params["wd"],
      params["final_norm"], params["score"], cos_f, sin_f)

    return scores3[:, 0, :]                                     # (B, num_labels)


def classifier_reward_forward(params, batch):
    """Equivalent of ClassifierRewardModel.forward(batch) with is_inference=True."""
    scores = _forward(params, batch["input_ids"], batch["attention_mask"])
    if scores.shape[-1] > 1:
        return {"scores": scores}
    return {"scores": scores.squeeze(-1)}                       # (B,)


# ----------------------------------- main ------------------------------------
if __name__ == "__main__":
    key = jax.random.PRNGKey(0)
    pkey, ikey = jax.random.split(key)

    params = init_params(pkey)

    B, S = 2, 8
    input_ids = jax.random.randint(ikey, (B, S), 0, VOCAB, dtype=jnp.int32)
    # second sequence has 2 padding tokens at the end
    attention_mask = jnp.array([[1, 1, 1, 1, 1, 1, 1, 1],
                                [1, 1, 1, 1, 1, 1, 0, 0]], dtype=jnp.int32)

    batch = {"input_ids": input_ids, "attention_mask": attention_mask,
             "is_inference": True}

    out = classifier_reward_forward(params, batch)
    scores = jax.block_until_ready(out["scores"])
    assert scores.shape == (B,), scores.shape
    assert bool(jnp.all(jnp.isfinite(scores)))
    print("KERNEL_OK")
</pallas_src>

<mosaic_0001>
module attributes {stable_mosaic.version = 11 : i64} {
  func.func @_reward_fwd_kernel(%arg0: i32, %arg1: memref<1x8x128xf32, #tpu.memory_space<vmem>>, %arg2: memref<1x1x8xf32, #tpu.memory_space<vmem>>, %arg3: memref<2x1x128xf32, #tpu.memory_space<vmem>>, %arg4: memref<2x128x384xbf16, #tpu.memory_space<vmem>>, %arg5: memref<2x128x128xbf16, #tpu.memory_space<vmem>>, %arg6: memref<2x1x128xf32, #tpu.memory_space<vmem>>, %arg7: memref<2x128x512xbf16, #tpu.memory_space<vmem>>, %arg8: memref<2x256x128xbf16, #tpu.memory_space<vmem>>, %arg9: memref<1x128xf32, #tpu.memory_space<vmem>>, %arg10: memref<128x1xf32, #tpu.memory_space<vmem>>, %arg11: memref<8x128xf32, #tpu.memory_space<vmem>>, %arg12: memref<8x128xf32, #tpu.memory_space<vmem>>, %arg13: memref<1x1x1xf32, #tpu.memory_space<vmem>>) attributes {dimension_semantics = [#tpu.dimension_semantics<parallel>], iteration_bounds = array<i64: 2>, scalar_prefetch = 0 : i64, scratch_operands = 0 : i64, tpu.core_type = #tpu.core_type<tc>, window_params = [{transform_indices = @transform_0, window_bounds = array<i64: 1, 8, 128>}, {transform_indices = @transform_1, window_bounds = array<i64: 1, 1, 8>}, {pipeline_mode = #tpu.pipeline_mode<synchronous>, transform_indices = @transform_2, window_bounds = array<i64: 2, 1, 128>}, {pipeline_mode = #tpu.pipeline_mode<synchronous>, transform_indices = @transform_3, window_bounds = array<i64: 2, 128, 384>}, {pipeline_mode = #tpu.pipeline_mode<synchronous>, transform_indices = @transform_4, window_bounds = array<i64: 2, 128, 128>}, {pipeline_mode = #tpu.pipeline_mode<synchronous>, transform_indices = @transform_5, window_bounds = array<i64: 2, 1, 128>}, {pipeline_mode = #tpu.pipeline_mode<synchronous>, transform_indices = @transform_6, window_bounds = array<i64: 2, 128, 512>}, {pipeline_mode = #tpu.pipeline_mode<synchronous>, transform_indices = @transform_7, window_bounds = array<i64: 2, 256, 128>}, {pipeline_mode = #tpu.pipeline_mode<synchronous>, transform_indices = @transform_8, window_bounds = array<i64: 1, 128>}, {pipeline_mode = #tpu.pipeline_mode<synchronous>, transform_indices = @transform_9, window_bounds = array<i64: 128, 1>}, {pipeline_mode = #tpu.pipeline_mode<synchronous>, transform_indices = @transform_10, window_bounds = array<i64: 8, 128>}, {pipeline_mode = #tpu.pipeline_mode<synchronous>, transform_indices = @transform_11, window_bounds = array<i64: 8, 128>}, {transform_indices = @transform_12, window_bounds = array<i64: 1, 1, 1>}]} {
    %c0 = arith.constant 0 : index
    %c0_0 = arith.constant 0 : index
    %c0_1 = arith.constant 0 : index
    %0 = vector.load %arg1[%c0, %c0_0, %c0_1] : memref<1x8x128xf32, #tpu.memory_space<vmem>>, vector<1x8x128xf32>
    %1 = vector.shape_cast %0 : vector<1x8x128xf32> to vector<8x128xf32>
    %c0_2 = arith.constant 0 : index
    %c0_3 = arith.constant 0 : index
    %c0_4 = arith.constant 0 : index
    %2 = vector.load %arg2[%c0_2, %c0_3, %c0_4] : memref<1x1x8xf32, #tpu.memory_space<vmem>>, vector<1x1x8xf32>
    %3 = vector.shape_cast %2 : vector<1x1x8xf32> to vector<1x8xf32>
    %4 = tpu.iota {dimensions = array<i32: 0>} : vector<8x8xi32>
    %5 = tpu.iota {dimensions = array<i32: 1>} : vector<8x8xi32>
    %6 = arith.cmpi sle, %5, %4 : vector<8x8xi32>
    %cst = arith.constant 5.000000e-01 : f32
    %7 = vector.broadcast %cst : f32 to vector<1x8xf32>
    %8 = arith.cmpf ogt, %3, %7 : vector<1x8xf32>
    %9 = vector.broadcast %8 : vector<1x8xi1> to vector<8x8xi1>
    %10 = arith.andi %6, %9 : vector<8x8xi1>
    %cst_5 = arith.constant 0.000000e+00 : f32
    %cst_6 = arith.constant -1.000000e+09 : f32
    %11 = vector.broadcast %cst_5 : f32 to vector<8x8xf32>
    %12 = vector.broadcast %cst_6 : f32 to vector<8x8xf32>
    %13 = arith.select %10, %11, %12 : vector<8x8xi1>, vector<8x8xf32>
    %c0_7 = arith.constant 0 : index
    %c0_8 = arith.constant 0 : index
    %14 = vector.load %arg11[%c0_7, %c0_8] : memref<8x128xf32, #tpu.memory_space<vmem>>, vector<8x128xf32>
    %c0_9 = arith.constant 0 : index
    %c0_10 = arith.constant 0 : index
    %15 = vector.load %arg12[%c0_9, %c0_10] : memref<8x128xf32, #tpu.memory_space<vmem>>, vector<8x128xf32>
    %16 = tpu.iota {dimensions = array<i32: 1>} : vector<8x128xi32>
    %c32_i32 = arith.constant 32 : i32
    %c0_i32 = arith.constant 0 : i32
    %17 = arith.cmpi eq, %c32_i32, %c0_i32 : i32
    %c1_i32 = arith.constant 1 : i32
    %18 = arith.select %17, %c1_i32, %c32_i32 : i32
    %19 = vector.broadcast %18 : i32 to vector<8x128xi32>
    %20 = arith.remsi %16, %19 : vector<8x128xi32>
    %c0_i32_11 = arith.constant 0 : i32
    %21 = vector.broadcast %c0_i32_11 : i32 to vector<8x128xi32>
    %22 = arith.cmpi ne, %20, %21 : vector<8x128xi32>
    %c0_i32_12 = arith.constant 0 : i32
    %23 = vector.broadcast %c0_i32_12 : i32 to vector<8x128xi32>
    %24 = arith.cmpi slt, %20, %23 : vector<8x128xi32>
    %c0_i32_13 = arith.constant 0 : i32
    %25 = arith.cmpi slt, %18, %c0_i32_13 : i32
    %26 = vector.broadcast %25 : i1 to vector<8x128xi1>
    %27 = vector.broadcast %26 : vector<8x128xi1> to vector<8x128xi1>
    %28 = arith.xori %24, %27 : vector<8x128xi1>
    %29 = arith.andi %28, %22 : vector<8x128xi1>
    %30 = vector.broadcast %18 : i32 to vector<8x128xi32>
    %31 = arith.addi %20, %30 : vector<8x128xi32>
    %32 = arith.select %29, %31, %20 : vector<8x128xi1>, vector<8x128xi32>
    %c16_i32 = arith.constant 16 : i32
    %33 = vector.broadcast %c16_i32 : i32 to vector<8x128xi32>
    %34 = arith.cmpi slt, %32, %33 : vector<8x128xi32>
    %c0_14 = arith.constant 0 : index
    %c0_15 = arith.constant 0 : index
    %c0_16 = arith.constant 0 : index
    %35 = vector.load %arg3[%c0_14, %c0_15, %c0_16] : memref<2x1x128xf32, #tpu.memory_space<vmem>>, vector<1x1x128xf32>
    %36 = vector.shape_cast %35 : vector<1x1x128xf32> to vector<1x128xf32>
    %37 = arith.mulf %1, %1 : vector<8x128xf32>
    %cst_17 = arith.constant dense<0.000000e+00> : vector<8xf32>
    %38 = vector.multi_reduction <add>, %37, %cst_17 [1] : vector<8x128xf32> to vector<8xf32>
    %39 = vector.shape_cast %38 : vector<8xf32> to vector<8x1xf32>
    %cst_18 = arith.constant 1.280000e+02 : f32
    %40 = vector.broadcast %cst_18 : f32 to vector<8x1xf32>
    %41 = arith.divf %39, %40 : vector<8x1xf32>
    %cst_19 = arith.constant 9.99999974E-6 : f32
    %42 = vector.broadcast %cst_19 : f32 to vector<8x1xf32>
    %43 = arith.addf %41, %42 : vector<8x1xf32>
    %44 = math.rsqrt %43 : vector<8x1xf32>
    %45 = vector.broadcast %44 : vector<8x1xf32> to vector<8x128xf32>
    %46 = arith.mulf %1, %45 : vector<8x128xf32>
    %47 = vector.broadcast %36 : vector<1x128xf32> to vector<8x128xf32>
    %48 = arith.mulf %46, %47 : vector<8x128xf32>
    %49 = arith.truncf %48 : vector<8x128xf32> to vector<8x128xbf16>
    %c0_20 = arith.constant 0 : index
    %c0_21 = arith.constant 0 : index
    %c0_22 = arith.constant 0 : index
    %50 = vector.load %arg4[%c0_20, %c0_21, %c0_22] : memref<2x128x384xbf16, #tpu.memory_space<vmem>>, vector<1x128x384xbf16>
    %51 = vector.shape_cast %50 : vector<1x128x384xbf16> to vector<128x384xbf16>
    %cst_23 = arith.constant dense<0.000000e+00> : vector<8x384xf32>
    %52 = tpu.matmul %49, %51, %cst_23 {dimension_numbers = #tpu.dot_dimension_numbers<[1], [0], [0], [1], [0, 0, 1, 1], [], []>} : vector<8x128xbf16>, vector<128x384xbf16>, vector<8x384xf32> -> vector<8x384xf32>
    %53 = vector.extract_strided_slice %52 {offsets = [0, 0], sizes = [8, 128], strides = [1, 1]} : vector<8x384xf32> to vector<8x128xf32>
    %c112_i32 = arith.constant 112 : i32
    %54 = tpu.dynamic_rotate %53 by %c112_i32 dim 1 : vector<8x128xf32>, i32 -> vector<8x128xf32>
    %c16_i32_24 = arith.constant 16 : i32
    %55 = tpu.dynamic_rotate %53 by %c16_i32_24 dim 1 : vector<8x128xf32>, i32 -> vector<8x128xf32>
    %56 = arith.select %34, %54, %55 : vector<8x128xi1>, vector<8x128xf32>
    %57 = arith.mulf %53, %14 : vector<8x128xf32>
    %58 = arith.mulf %56, %15 : vector<8x128xf32>
    %59 = arith.addf %57, %58 : vector<8x128xf32>
    %60 = vector.extract_strided_slice %52 {offsets = [0, 128], sizes = [8, 128], strides = [1, 1]} : vector<8x384xf32> to vector<8x128xf32>
    %c112_i32_25 = arith.constant 112 : i32
    %61 = tpu.dynamic_rotate %60 by %c112_i32_25 dim 1 : vector<8x128xf32>, i32 -> vector<8x128xf32>
    %c16_i32_26 = arith.constant 16 : i32
    %62 = tpu.dynamic_rotate %60 by %c16_i32_26 dim 1 : vector<8x128xf32>, i32 -> vector<8x128xf32>
    %63 = arith.select %34, %61, %62 : vector<8x128xi1>, vector<8x128xf32>
    %64 = arith.mulf %60, %14 : vector<8x128xf32>
    %65 = arith.mulf %63, %15 : vector<8x128xf32>
    %66 = arith.addf %64, %65 : vector<8x128xf32>
    %67 = vector.extract_strided_slice %52 {offsets = [0, 256], sizes = [8, 128], strides = [1, 1]} : vector<8x384xf32> to vector<8x128xf32>
    %68 = vector.extract_strided_slice %59 {offsets = [0, 0], sizes = [8, 32], strides = [1, 1]} : vector<8x128xf32> to vector<8x32xf32>
    %69 = arith.truncf %68 : vector<8x32xf32> to vector<8x32xbf16>
    %70 = vector.extract_strided_slice %66 {offsets = [0, 0], sizes = [8, 32], strides = [1, 1]} : vector<8x128xf32> to vector<8x32xf32>
    %71 = arith.truncf %70 : vector<8x32xf32> to vector<8x32xbf16>
    %72 = vector.extract_strided_slice %67 {offsets = [0, 0], sizes = [8, 32], strides = [1, 1]} : vector<8x128xf32> to vector<8x32xf32>
    %73 = arith.truncf %72 : vector<8x32xf32> to vector<8x32xbf16>
    "tpu.trace_start"() <{level = 10 : i32, message = "qd,kd->qk"}> : () -> ()
    %cst_27 = arith.constant dense<0.000000e+00> : vector<8x8xf32>
    %74 = tpu.matmul %69, %71, %cst_27 {dimension_numbers = #tpu.dot_dimension_numbers<[1], [1], [0], [0], [0, 0, 1, 0], [], []>} : vector<8x32xbf16>, vector<8x32xbf16>, vector<8x8xf32> -> vector<8x8xf32>
    "tpu.trace_stop"() : () -> ()
    %cst_28 = arith.constant 0.176776692 : f32
    %75 = vector.broadcast %cst_28 : f32 to vector<8x8xf32>
    %76 = arith.mulf %74, %75 : vector<8x8xf32>
    %77 = arith.addf %76, %13 : vector<8x8xf32>
    %cst_29 = arith.constant dense<0xFF800000> : vector<8xf32>
    %78 = vector.multi_reduction <maximumf>, %77, %cst_29 [1] : vector<8x8xf32> to vector<8xf32>
    %79 = vector.shape_cast %78 : vector<8xf32> to vector<8x1xf32>
    %80 = vector.broadcast %79 : vector<8x1xf32> to vector<8x8xf32>
    %81 = arith.subf %77, %80 : vector<8x8xf32>
    %82 = math.exp %81 : vector<8x8xf32>
    %cst_30 = arith.constant dense<0.000000e+00> : vector<8xf32>
    %83 = vector.multi_reduction <add>, %82, %cst_30 [1] : vector<8x8xf32> to vector<8xf32>
    %84 = vector.shape_cast %83 : vector<8xf32> to vector<8x1xf32>
    %85 = tpu.reciprocal %84 {approx = true} : vector<8x1xf32> -> vector<8x1xf32>
    %86 = vector.broadcast %85 : vector<8x1xf32> to vector<8x8xf32>
    %87 = arith.mulf %82, %86 : vector<8x8xf32>
    %88 = arith.truncf %87 : vector<8x8xf32> to vector<8x8xbf16>
    "tpu.trace_start"() <{level = 10 : i32, message = "qk,kd->qd"}> : () -> ()
    %cst_31 = arith.constant dense<0.000000e+00> : vector<8x32xf32>
    %89 = tpu.matmul %88, %73, %cst_31 {dimension_numbers = #tpu.dot_dimension_numbers<[1], [0], [0], [1], [0, 0, 1, 1], [], []>} : vector<8x8xbf16>, vector<8x32xbf16>, vector<8x32xf32> -> vector<8x32xf32>
    "tpu.trace_stop"() : () -> ()
    %90 = vector.extract_strided_slice %59 {offsets = [0, 32], sizes = [8, 32], strides = [1, 1]} : vector<8x128xf32> to vector<8x32xf32>
    %91 = arith.truncf %90 : vector<8x32xf32> to vector<8x32xbf16>
    %92 = vector.extract_strided_slice %66 {offsets = [0, 32], sizes = [8, 32], strides = [1, 1]} : vector<8x128xf32> to vector<8x32xf32>
    %93 = arith.truncf %92 : vector<8x32xf32> to vector<8x32xbf16>
    %94 = vector.extract_strided_slice %67 {offsets = [0, 32], sizes = [8, 32], strides = [1, 1]} : vector<8x128xf32> to vector<8x32xf32>
    %95 = arith.truncf %94 : vector<8x32xf32> to vector<8x32xbf16>
    "tpu.trace_start"() <{level = 10 : i32, message = "qd,kd->qk"}> : () -> ()
    %cst_32 = arith.constant dense<0.000000e+00> : vector<8x8xf32>
    %96 = tpu.matmul %91, %93, %cst_32 {dimension_numbers = #tpu.dot_dimension_numbers<[1], [1], [0], [0], [0, 0, 1, 0], [], []>} : vector<8x32xbf16>, vector<8x32xbf16>, vector<8x8xf32> -> vector<8x8xf32>
    "tpu.trace_stop"() : () -> ()
    %cst_33 = arith.constant 0.176776692 : f32
    %97 = vector.broadcast %cst_33 : f32 to vector<8x8xf32>
    %98 = arith.mulf %96, %97 : vector<8x8xf32>
    %99 = arith.addf %98, %13 : vector<8x8xf32>
    %cst_34 = arith.constant dense<0xFF800000> : vector<8xf32>
    %100 = vector.multi_reduction <maximumf>, %99, %cst_34 [1] : vector<8x8xf32> to vector<8xf32>
    %101 = vector.shape_cast %100 : vector<8xf32> to vector<8x1xf32>
    %102 = vector.broadcast %101 : vector<8x1xf32> to vector<8x8xf32>
    %103 = arith.subf %99, %102 : vector<8x8xf32>
    %104 = math.exp %103 : vector<8x8xf32>
    %cst_35 = arith.constant dense<0.000000e+00> : vector<8xf32>
    %105 = vector.multi_reduction <add>, %104, %cst_35 [1] : vector<8x8xf32> to vector<8xf32>
    %106 = vector.shape_cast %105 : vector<8xf32> to vector<8x1xf32>
    %107 = tpu.reciprocal %106 {approx = true} : vector<8x1xf32> -> vector<8x1xf32>
    %108 = vector.broadcast %107 : vector<8x1xf32> to vector<8x8xf32>
    %109 = arith.mulf %104, %108 : vector<8x8xf32>
    %110 = arith.truncf %109 : vector<8x8xf32> to vector<8x8xbf16>
    "tpu.trace_start"() <{level = 10 : i32, message = "qk,kd->qd"}> : () -> ()
    %cst_36 = arith.constant dense<0.000000e+00> : vector<8x32xf32>
    %111 = tpu.matmul %110, %95, %cst_36 {dimension_numbers = #tpu.dot_dimension_numbers<[1], [0], [0], [1], [0, 0, 1, 1], [], []>} : vector<8x8xbf16>, vector<8x32xbf16>, vector<8x32xf32> -> vector<8x32xf32>
    "tpu.trace_stop"() : () -> ()
    %112 = vector.extract_strided_slice %59 {offsets = [0, 64], sizes = [8, 32], strides = [1, 1]} : vector<8x128xf32> to vector<8x32xf32>
    %113 = arith.truncf %112 : vector<8x32xf32> to vector<8x32xbf16>
    %114 = vector.extract_strided_slice %66 {offsets = [0, 64], sizes = [8, 32], strides = [1, 1]} : vector<8x128xf32> to vector<8x32xf32>
    %115 = arith.truncf %114 : vector<8x32xf32> to vector<8x32xbf16>
    %116 = vector.extract_strided_slice %67 {offsets = [0, 64], sizes = [8, 32], strides = [1, 1]} : vector<8x128xf32> to vector<8x32xf32>
    %117 = arith.truncf %116 : vector<8x32xf32> to vector<8x32xbf16>
    "tpu.trace_start"() <{level = 10 : i32, message = "qd,kd->qk"}> : () -> ()
    %cst_37 = arith.constant dense<0.000000e+00> : vector<8x8xf32>
    %118 = tpu.matmul %113, %115, %cst_37 {dimension_numbers = #tpu.dot_dimension_numbers<[1], [1], [0], [0], [0, 0, 1, 0], [], []>} : vector<8x32xbf16>, vector<8x32xbf16>, vector<8x8xf32> -> vector<8x8xf32>
    "tpu.trace_stop"() : () -> ()
    %cst_38 = arith.constant 0.176776692 : f32
    %119 = vector.broadcast %cst_38 : f32 to vector<8x8xf32>
    %120 = arith.mulf %118, %119 : vector<8x8xf32>
    %121 = arith.addf %120, %13 : vector<8x8xf32>
    %cst_39 = arith.constant dense<0xFF800000> : vector<8xf32>
    %122 = vector.multi_reduction <maximumf>, %121, %cst_39 [1] : vector<8x8xf32> to vector<8xf32>
    %123 = vector.shape_cast %122 : vector<8xf32> to vector<8x1xf32>
    %124 = vector.broadcast %123 : vector<8x1xf32> to vector<8x8xf32>
    %125 = arith.subf %121, %124 : vector<8x8xf32>
    %126 = math.exp %125 : vector<8x8xf32>
    %cst_40 = arith.constant dense<0.000000e+00> : vector<8xf32>
    %127 = vector.multi_reduction <add>, %126, %cst_40 [1] : vector<8x8xf32> to vector<8xf32>
    %128 = vector.shape_cast %127 : vector<8xf32> to vector<8x1xf32>
    %129 = tpu.reciprocal %128 {approx = true} : vector<8x1xf32> -> vector<8x1xf32>
    %130 = vector.broadcast %129 : vector<8x1xf32> to vector<8x8xf32>
    %131 = arith.mulf %126, %130 : vector<8x8xf32>
    %132 = arith.truncf %131 : vector<8x8xf32> to vector<8x8xbf16>
    "tpu.trace_start"() <{level = 10 : i32, message = "qk,kd->qd"}> : () -> ()
    %cst_41 = arith.constant dense<0.000000e+00> : vector<8x32xf32>
    %133 = tpu.matmul %132, %117, %cst_41 {dimension_numbers = #tpu.dot_dimension_numbers<[1], [0], [0], [1], [0, 0, 1, 1], [], []>} : vector<8x8xbf16>, vector<8x32xbf16>, vector<8x32xf32> -> vector<8x32xf32>
    "tpu.trace_stop"() : () -> ()
    %134 = vector.extract_strided_slice %59 {offsets = [0, 96], sizes = [8, 32], strides = [1, 1]} : vector<8x128xf32> to vector<8x32xf32>
    %135 = arith.truncf %134 : vector<8x32xf32> to vector<8x32xbf16>
    %136 = vector.extract_strided_slice %66 {offsets = [0, 96], sizes = [8, 32], strides = [1, 1]} : vector<8x128xf32> to vector<8x32xf32>
    %137 = arith.truncf %136 : vector<8x32xf32> to vector<8x32xbf16>
    %138 = vector.extract_strided_slice %67 {offsets = [0, 96], sizes = [8, 32], strides = [1, 1]} : vector<8x128xf32> to vector<8x32xf32>
    %139 = arith.truncf %138 : vector<8x32xf32> to vector<8x32xbf16>
    "tpu.trace_start"() <{level = 10 : i32, message = "qd,kd->qk"}> : () -> ()
    %cst_42 = arith.constant dense<0.000000e+00> : vector<8x8xf32>
    %140 = tpu.matmul %135, %137, %cst_42 {dimension_numbers = #tpu.dot_dimension_numbers<[1], [1], [0], [0], [0, 0, 1, 0], [], []>} : vector<8x32xbf16>, vector<8x32xbf16>, vector<8x8xf32> -> vector<8x8xf32>
    "tpu.trace_stop"() : () -> ()
    %cst_43 = arith.constant 0.176776692 : f32
    %141 = vector.broadcast %cst_43 : f32 to vector<8x8xf32>
    %142 = arith.mulf %140, %141 : vector<8x8xf32>
    %143 = arith.addf %142, %13 : vector<8x8xf32>
    %cst_44 = arith.constant dense<0xFF800000> : vector<8xf32>
    %144 = vector.multi_reduction <maximumf>, %143, %cst_44 [1] : vector<8x8xf32> to vector<8xf32>
    %145 = vector.shape_cast %144 : vector<8xf32> to vector<8x1xf32>
    %146 = vector.broadcast %145 : vector<8x1xf32> to vector<8x8xf32>
    %147 = arith.subf %143, %146 : vector<8x8xf32>
    %148 = math.exp %147 : vector<8x8xf32>
    %cst_45 = arith.constant dense<0.000000e+00> : vector<8xf32>
    %149 = vector.multi_reduction <add>, %148, %cst_45 [1] : vector<8x8xf32> to vector<8xf32>
    %150 = vector.shape_cast %149 : vector<8xf32> to vector<8x1xf32>
    %151 = tpu.reciprocal %150 {approx = true} : vector<8x1xf32> -> vector<8x1xf32>
    %152 = vector.broadcast %151 : vector<8x1xf32> to vector<8x8xf32>
    %153 = arith.mulf %148, %152 : vector<8x8xf32>
    %154 = arith.truncf %153 : vector<8x8xf32> to vector<8x8xbf16>
    "tpu.trace_start"() <{level = 10 : i32, message = "qk,kd->qd"}> : () -> ()
    %cst_46 = arith.constant dense<0.000000e+00> : vector<8x32xf32>
    %155 = tpu.matmul %154, %139, %cst_46 {dimension_numbers = #tpu.dot_dimension_numbers<[1], [0], [0], [1], [0, 0, 1, 1], [], []>} : vector<8x8xbf16>, vector<8x32xbf16>, vector<8x32xf32> -> vector<8x32xf32>
    "tpu.trace_stop"() : () -> ()
    %156 = tpu.concatenate %89, %111, %133, %155 in 1 : vector<8x32xf32>, vector<8x32xf32>, vector<8x32xf32>, vector<8x32xf32> -> vector<8x128xf32>
    %157 = arith.truncf %156 : vector<8x128xf32> to vector<8x128xbf16>
    %c0_47 = arith.constant 0 : index
    %c0_48 = arith.constant 0 : index
    %c0_49 = arith.constant 0 : index
    %158 = vector.load %arg5[%c0_47, %c0_48, %c0_49] : memref<2x128x128xbf16, #tpu.memory_space<vmem>>, vector<1x128x128xbf16>
    %159 = vector.shape_cast %158 : vector<1x128x128xbf16> to vector<128x128xbf16>
    %cst_50 = arith.constant dense<0.000000e+00> : vector<8x128xf32>
    %160 = tpu.matmul %157, %159, %cst_50 {dimension_numbers = #tpu.dot_dimension_numbers<[1], [0], [0], [1], [0, 0, 1, 1], [], []>} : vector<8x128xbf16>, vector<128x128xbf16>, vector<8x128xf32> -> vector<8x128xf32>
    %161 = arith.addf %1, %160 : vector<8x128xf32>
    %c0_51 = arith.constant 0 : index
    %c0_52 = arith.constant 0 : index
    %c0_53 = arith.constant 0 : index
    %162 = vector.load %arg6[%c0_51, %c0_52, %c0_53] : memref<2x1x128xf32, #tpu.memory_space<vmem>>, vector<1x1x128xf32>
    %163 = vector.shape_cast %162 : vector<1x1x128xf32> to vector<1x128xf32>
    %164 = arith.mulf %161, %161 : vector<8x128xf32>
    %cst_54 = arith.constant dense<0.000000e+00> : vector<8xf32>
    %165 = vector.multi_reduction <add>, %164, %cst_54 [1] : vector<8x128xf32> to vector<8xf32>
    %166 = vector.shape_cast %165 : vector<8xf32> to vector<8x1xf32>
    %cst_55 = arith.constant 1.280000e+02 : f32
    %167 = vector.broadcast %cst_55 : f32 to vector<8x1xf32>
    %168 = arith.divf %166, %167 : vector<8x1xf32>
    %cst_56 = arith.constant 9.99999974E-6 : f32
    %169 = vector.broadcast %cst_56 : f32 to vector<8x1xf32>
    %170 = arith.addf %168, %169 : vector<8x1xf32>
    %171 = math.rsqrt %170 : vector<8x1xf32>
    %172 = vector.broadcast %171 : vector<8x1xf32> to vector<8x128xf32>
    %173 = arith.mulf %161, %172 : vector<8x128xf32>
    %174 = vector.broadcast %163 : vector<1x128xf32> to vector<8x128xf32>
    %175 = arith.mulf %173, %174 : vector<8x128xf32>
    %176 = arith.truncf %175 : vector<8x128xf32> to vector<8x128xbf16>
    %c0_57 = arith.constant 0 : index
    %c0_58 = arith.constant 0 : index
    %c0_59 = arith.constant 0 : index
    %177 = vector.load %arg7[%c0_57, %c0_58, %c0_59] : memref<2x128x512xbf16, #tpu.memory_space<vmem>>, vector<1x128x512xbf16>
    %178 = vector.shape_cast %177 : vector<1x128x512xbf16> to vector<128x512xbf16>
    %cst_60 = arith.constant dense<0.000000e+00> : vector<8x512xf32>
    %179 = tpu.matmul %176, %178, %cst_60 {dimension_numbers = #tpu.dot_dimension_numbers<[1], [0], [0], [1], [0, 0, 1, 1], [], []>} : vector<8x128xbf16>, vector<128x512xbf16>, vector<8x512xf32> -> vector<8x512xf32>
    %180 = vector.extract_strided_slice %179 {offsets = [0, 0], sizes = [8, 256], strides = [1, 1]} : vector<8x512xf32> to vector<8x256xf32>
    %181 = vector.extract_strided_slice %179 {offsets = [0, 256], sizes = [8, 256], strides = [1, 1]} : vector<8x512xf32> to vector<8x256xf32>
    %182 = arith.negf %180 : vector<8x256xf32>
    %183 = math.exp %182 : vector<8x256xf32>
    %cst_61 = arith.constant 1.000000e+00 : f32
    %184 = vector.broadcast %cst_61 : f32 to vector<8x256xf32>
    %185 = arith.addf %184, %183 : vector<8x256xf32>
    %186 = arith.divf %184, %185 : vector<8x256xf32>
    %187 = arith.mulf %180, %186 : vector<8x256xf32>
    %188 = arith.mulf %187, %181 : vector<8x256xf32>
    %189 = arith.truncf %188 : vector<8x256xf32> to vector<8x256xbf16>
    %c0_62 = arith.constant 0 : index
    %c0_63 = arith.constant 0 : index
    %c0_64 = arith.constant 0 : index
    %190 = vector.load %arg8[%c0_62, %c0_63, %c0_64] : memref<2x256x128xbf16, #tpu.memory_space<vmem>>, vector<1x256x128xbf16>
    %191 = vector.shape_cast %190 : vector<1x256x128xbf16> to vector<256x128xbf16>
    %cst_65 = arith.constant dense<0.000000e+00> : vector<8x128xf32>
    %192 = tpu.matmul %189, %191, %cst_65 {dimension_numbers = #tpu.dot_dimension_numbers<[1], [0], [0], [1], [0, 0, 1, 1], [], []>} : vector<8x256xbf16>, vector<256x128xbf16>, vector<8x128xf32> -> vector<8x128xf32>
    %193 = arith.addf %161, %192 : vector<8x128xf32>
    %c1 = arith.constant 1 : index
    %c0_66 = arith.constant 0 : index
    %c0_67 = arith.constant 0 : index
    %194 = vector.load %arg3[%c1, %c0_66, %c0_67] : memref<2x1x128xf32, #tpu.memory_space<vmem>>, vector<1x1x128xf32>
    %195 = vector.shape_cast %194 : vector<1x1x128xf32> to vector<1x128xf32>
    %196 = arith.mulf %193, %193 : vector<8x128xf32>
    %cst_68 = arith.constant dense<0.000000e+00> : vector<8xf32>
    %197 = vector.multi_reduction <add>, %196, %cst_68 [1] : vector<8x128xf32> to vector<8xf32>
    %198 = vector.shape_cast %197 : vector<8xf32> to vector<8x1xf32>
    %cst_69 = arith.constant 1.280000e+02 : f32
    %199 = vector.broadcast %cst_69 : f32 to vector<8x1xf32>
    %200 = arith.divf %198, %199 : vector<8x1xf32>
    %cst_70 = arith.constant 9.99999974E-6 : f32
    %201 = vector.broadcast %cst_70 : f32 to vector<8x1xf32>
    %202 = arith.addf %200, %201 : vector<8x1xf32>
    %203 = math.rsqrt %202 : vector<8x1xf32>
    %204 = vector.broadcast %203 : vector<8x1xf32> to vector<8x128xf32>
    %205 = arith.mulf %193, %204 : vector<8x128xf32>
    %206 = vector.broadcast %195 : vector<1x128xf32> to vector<8x128xf32>
    %207 = arith.mulf %205, %206 : vector<8x128xf32>
    %208 = arith.truncf %207 : vector<8x128xf32> to vector<8x128xbf16>
    %c1_71 = arith.constant 1 : index
    %c0_72 = arith.constant 0 : index
    %c0_73 = arith.constant 0 : index
    %209 = vector.load %arg4[%c1_71, %c0_72, %c0_73] : memref<2x128x384xbf16, #tpu.memory_space<vmem>>, vector<1x128x384xbf16>
    %210 = vector.shape_cast %209 : vector<1x128x384xbf16> to vector<128x384xbf16>
    %cst_74 = arith.constant dense<0.000000e+00> : vector<8x384xf32>
    %211 = tpu.matmul %208, %210, %cst_74 {dimension_numbers = #tpu.dot_dimension_numbers<[1], [0], [0], [1], [0, 0, 1, 1], [], []>} : vector<8x128xbf16>, vector<128x384xbf16>, vector<8x384xf32> -> vector<8x384xf32>
    %212 = vector.extract_strided_slice %211 {offsets = [0, 0], sizes = [8, 128], strides = [1, 1]} : vector<8x384xf32> to vector<8x128xf32>
    %c112_i32_75 = arith.constant 112 : i32
    %213 = tpu.dynamic_rotate %212 by %c112_i32_75 dim 1 : vector<8x128xf32>, i32 -> vector<8x128xf32>
    %c16_i32_76 = arith.constant 16 : i32
    %214 = tpu.dynamic_rotate %212 by %c16_i32_76 dim 1 : vector<8x128xf32>, i32 -> vector<8x128xf32>
    %215 = arith.select %34, %213, %214 : vector<8x128xi1>, vector<8x128xf32>
    %216 = arith.mulf %212, %14 : vector<8x128xf32>
    %217 = arith.mulf %215, %15 : vector<8x128xf32>
    %218 = arith.addf %216, %217 : vector<8x128xf32>
    %219 = vector.extract_strided_slice %211 {offsets = [0, 128], sizes = [8, 128], strides = [1, 1]} : vector<8x384xf32> to vector<8x128xf32>
    %c112_i32_77 = arith.constant 112 : i32
    %220 = tpu.dynamic_rotate %219 by %c112_i32_77 dim 1 : vector<8x128xf32>, i32 -> vector<8x128xf32>
    %c16_i32_78 = arith.constant 16 : i32
    %221 = tpu.dynamic_rotate %219 by %c16_i32_78 dim 1 : vector<8x128xf32>, i32 -> vector<8x128xf32>
    %222 = arith.select %34, %220, %221 : vector<8x128xi1>, vector<8x128xf32>
    %223 = arith.mulf %219, %14 : vector<8x128xf32>
    %224 = arith.mulf %222, %15 : vector<8x128xf32>
    %225 = arith.addf %223, %224 : vector<8x128xf32>
    %226 = vector.extract_strided_slice %211 {offsets = [0, 256], sizes = [8, 128], strides = [1, 1]} : vector<8x384xf32> to vector<8x128xf32>
    %227 = vector.extract_strided_slice %218 {offsets = [0, 0], sizes = [8, 32], strides = [1, 1]} : vector<8x128xf32> to vector<8x32xf32>
    %228 = arith.truncf %227 : vector<8x32xf32> to vector<8x32xbf16>
    %229 = vector.extract_strided_slice %225 {offsets = [0, 0], sizes = [8, 32], strides = [1, 1]} : vector<8x128xf32> to vector<8x32xf32>
    %230 = arith.truncf %229 : vector<8x32xf32> to vector<8x32xbf16>
    %231 = vector.extract_strided_slice %226 {offsets = [0, 0], sizes = [8, 32], strides = [1, 1]} : vector<8x128xf32> to vector<8x32xf32>
    %232 = arith.truncf %231 : vector<8x32xf32> to vector<8x32xbf16>
    "tpu.trace_start"() <{level = 10 : i32, message = "qd,kd->qk"}> : () -> ()
    %cst_79 = arith.constant dense<0.000000e+00> : vector<8x8xf32>
    %233 = tpu.matmul %228, %230, %cst_79 {dimension_numbers = #tpu.dot_dimension_numbers<[1], [1], [0], [0], [0, 0, 1, 0], [], []>} : vector<8x32xbf16>, vector<8x32xbf16>, vector<8x8xf32> -> vector<8x8xf32>
    "tpu.trace_stop"() : () -> ()
    %cst_80 = arith.constant 0.176776692 : f32
    %234 = vector.broadcast %cst_80 : f32 to vector<8x8xf32>
    %235 = arith.mulf %233, %234 : vector<8x8xf32>
    %236 = arith.addf %235, %13 : vector<8x8xf32>
    %cst_81 = arith.constant dense<0xFF800000> : vector<8xf32>
    %237 = vector.multi_reduction <maximumf>, %236, %cst_81 [1] : vector<8x8xf32> to vector<8xf32>
    %238 = vector.shape_cast %237 : vector<8xf32> to vector<8x1xf32>
    %239 = vector.broadcast %238 : vector<8x1xf32> to vector<8x8xf32>
    %240 = arith.subf %236, %239 : vector<8x8xf32>
    %241 = math.exp %240 : vector<8x8xf32>
    %cst_82 = arith.constant dense<0.000000e+00> : vector<8xf32>
    %242 = vector.multi_reduction <add>, %241, %cst_82 [1] : vector<8x8xf32> to vector<8xf32>
    %243 = vector.shape_cast %242 : vector<8xf32> to vector<8x1xf32>
    %244 = tpu.reciprocal %243 {approx = true} : vector<8x1xf32> -> vector<8x1xf32>
    %245 = vector.broadcast %244 : vector<8x1xf32> to vector<8x8xf32>
    %246 = arith.mulf %241, %245 : vector<8x8xf32>
    %247 = arith.truncf %246 : vector<8x8xf32> to vector<8x8xbf16>
    "tpu.trace_start"() <{level = 10 : i32, message = "qk,kd->qd"}> : () -> ()
    %cst_83 = arith.constant dense<0.000000e+00> : vector<8x32xf32>
    %248 = tpu.matmul %247, %232, %cst_83 {dimension_numbers = #tpu.dot_dimension_numbers<[1], [0], [0], [1], [0, 0, 1, 1], [], []>} : vector<8x8xbf16>, vector<8x32xbf16>, vector<8x32xf32> -> vector<8x32xf32>
    "tpu.trace_stop"() : () -> ()
    %249 = vector.extract_strided_slice %218 {offsets = [0, 32], sizes = [8, 32], strides = [1, 1]} : vector<8x128xf32> to vector<8x32xf32>
    %250 = arith.truncf %249 : vector<8x32xf32> to vector<8x32xbf16>
    %251 = vector.extract_strided_slice %225 {offsets = [0, 32], sizes = [8, 32], strides = [1, 1]} : vector<8x128xf32> to vector<8x32xf32>
    %252 = arith.truncf %251 : vector<8x32xf32> to vector<8x32xbf16>
    %253 = vector.extract_strided_slice %226 {offsets = [0, 32], sizes = [8, 32], strides = [1, 1]} : vector<8x128xf32> to vector<8x32xf32>
    %254 = arith.truncf %253 : vector<8x32xf32> to vector<8x32xbf16>
    "tpu.trace_start"() <{level = 10 : i32, message = "qd,kd->qk"}> : () -> ()
    %cst_84 = arith.constant dense<0.000000e+00> : vector<8x8xf32>
    %255 = tpu.matmul %250, %252, %cst_84 {dimension_numbers = #tpu.dot_dimension_numbers<[1], [1], [0], [0], [0, 0, 1, 0], [], []>} : vector<8x32xbf16>, vector<8x32xbf16>, vector<8x8xf32> -> vector<8x8xf32>
    "tpu.trace_stop"() : () -> ()
    %cst_85 = arith.constant 0.176776692 : f32
    %256 = vector.broadcast %cst_85 : f32 to vector<8x8xf32>
    %257 = arith.mulf %255, %256 : vector<8x8xf32>
    %258 = arith.addf %257, %13 : vector<8x8xf32>
    %cst_86 = arith.constant dense<0xFF800000> : vector<8xf32>
    %259 = vector.multi_reduction <maximumf>, %258, %cst_86 [1] : vector<8x8xf32> to vector<8xf32>
    %260 = vector.shape_cast %259 : vector<8xf32> to vector<8x1xf32>
    %261 = vector.broadcast %260 : vector<8x1xf32> to vector<8x8xf32>
    %262 = arith.subf %258, %261 : vector<8x8xf32>
    %263 = math.exp %262 : vector<8x8xf32>
    %cst_87 = arith.constant dense<0.000000e+00> : vector<8xf32>
    %264 = vector.multi_reduction <add>, %263, %cst_87 [1] : vector<8x8xf32> to vector<8xf32>
    %265 = vector.shape_cast %264 : vector<8xf32> to vector<8x1xf32>
    %266 = tpu.reciprocal %265 {approx = true} : vector<8x1xf32> -> vector<8x1xf32>
    %267 = vector.broadcast %266 : vector<8x1xf32> to vector<8x8xf32>
    %268 = arith.mulf %263, %267 : vector<8x8xf32>
    %269 = arith.truncf %268 : vector<8x8xf32> to vector<8x8xbf16>
    "tpu.trace_start"() <{level = 10 : i32, message = "qk,kd->qd"}> : () -> ()
    %cst_88 = arith.constant dense<0.000000e+00> : vector<8x32xf32>
    %270 = tpu.matmul %269, %254, %cst_88 {dimension_numbers = #tpu.dot_dimension_numbers<[1], [0], [0], [1], [0, 0, 1, 1], [], []>} : vector<8x8xbf16>, vector<8x32xbf16>, vector<8x32xf32> -> vector<8x32xf32>
    "tpu.trace_stop"() : () -> ()
    %271 = vector.extract_strided_slice %218 {offsets = [0, 64], sizes = [8, 32], strides = [1, 1]} : vector<8x128xf32> to vector<8x32xf32>
    %272 = arith.truncf %271 : vector<8x32xf32> to vector<8x32xbf16>
    %273 = vector.extract_strided_slice %225 {offsets = [0, 64], sizes = [8, 32], strides = [1, 1]} : vector<8x128xf32> to vector<8x32xf32>
    %274 = arith.truncf %273 : vector<8x32xf32> to vector<8x32xbf16>
    %275 = vector.extract_strided_slice %226 {offsets = [0, 64], sizes = [8, 32], strides = [1, 1]} : vector<8x128xf32> to vector<8x32xf32>
    %276 = arith.truncf %275 : vector<8x32xf32> to vector<8x32xbf16>
    "tpu.trace_start"() <{level = 10 : i32, message = "qd,kd->qk"}> : () -> ()
    %cst_89 = arith.constant dense<0.000000e+00> : vector<8x8xf32>
    %277 = tpu.matmul %272, %274, %cst_89 {dimension_numbers = #tpu.dot_dimension_numbers<[1], [1], [0], [0], [0, 0, 1, 0], [], []>} : vector<8x32xbf16>, vector<8x32xbf16>, vector<8x8xf32> -> vector<8x8xf32>
    "tpu.trace_stop"() : () -> ()
    %cst_90 = arith.constant 0.176776692 : f32
    %278 = vector.broadcast %cst_90 : f32 to vector<8x8xf32>
    %279 = arith.mulf %277, %278 : vector<8x8xf32>
    %280 = arith.addf %279, %13 : vector<8x8xf32>
    %cst_91 = arith.constant dense<0xFF800000> : vector<8xf32>
    %281 = vector.multi_reduction <maximumf>, %280, %cst_91 [1] : vector<8x8xf32> to vector<8xf32>
    %282 = vector.shape_cast %281 : vector<8xf32> to vector<8x1xf32>
    %283 = vector.broadcast %282 : vector<8x1xf32> to vector<8x8xf32>
    %284 = arith.subf %280, %283 : vector<8x8xf32>
    %285 = math.exp %284 : vector<8x8xf32>
    %cst_92 = arith.constant dense<0.000000e+00> : vector<8xf32>
    %286 = vector.multi_reduction <add>, %285, %cst_92 [1] : vector<8x8xf32> to vector<8xf32>
    %287 = vector.shape_cast %286 : vector<8xf32> to vector<8x1xf32>
    %288 = tpu.reciprocal %287 {approx = true} : vector<8x1xf32> -> vector<8x1xf32>
    %289 = vector.broadcast %288 : vector<8x1xf32> to vector<8x8xf32>
    %290 = arith.mulf %285, %289 : vector<8x8xf32>
    %291 = arith.truncf %290 : vector<8x8xf32> to vector<8x8xbf16>
    "tpu.trace_start"() <{level = 10 : i32, message = "qk,kd->qd"}> : () -> ()
    %cst_93 = arith.constant dense<0.000000e+00> : vector<8x32xf32>
    %292 = tpu.matmul %291, %276, %cst_93 {dimension_numbers = #tpu.dot_dimension_numbers<[1], [0], [0], [1], [0, 0, 1, 1], [], []>} : vector<8x8xbf16>, vector<8x32xbf16>, vector<8x32xf32> -> vector<8x32xf32>
    "tpu.trace_stop"() : () -> ()
    %293 = vector.extract_strided_slice %218 {offsets = [0, 96], sizes = [8, 32], strides = [1, 1]} : vector<8x128xf32> to vector<8x32xf32>
    %294 = arith.truncf %293 : vector<8x32xf32> to vector<8x32xbf16>
    %295 = vector.extract_strided_slice %225 {offsets = [0, 96], sizes = [8, 32], strides = [1, 1]} : vector<8x128xf32> to vector<8x32xf32>
    %296 = arith.truncf %295 : vector<8x32xf32> to vector<8x32xbf16>
    %297 = vector.extract_strided_slice %226 {offsets = [0, 96], sizes = [8, 32], strides = [1, 1]} : vector<8x128xf32> to vector<8x32xf32>
    %298 = arith.truncf %297 : vector<8x32xf32> to vector<8x32xbf16>
    "tpu.trace_start"() <{level = 10 : i32, message = "qd,kd->qk"}> : () -> ()
    %cst_94 = arith.constant dense<0.000000e+00> : vector<8x8xf32>
    %299 = tpu.matmul %294, %296, %cst_94 {dimension_numbers = #tpu.dot_dimension_numbers<[1], [1], [0], [0], [0, 0, 1, 0], [], []>} : vector<8x32xbf16>, vector<8x32xbf16>, vector<8x8xf32> -> vector<8x8xf32>
    "tpu.trace_stop"() : () -> ()
    %cst_95 = arith.constant 0.176776692 : f32
    %300 = vector.broadcast %cst_95 : f32 to vector<8x8xf32>
    %301 = arith.mulf %299, %300 : vector<8x8xf32>
    %302 = arith.addf %301, %13 : vector<8x8xf32>
    %cst_96 = arith.constant dense<0xFF800000> : vector<8xf32>
    %303 = vector.multi_reduction <maximumf>, %302, %cst_96 [1] : vector<8x8xf32> to vector<8xf32>
    %304 = vector.shape_cast %303 : vector<8xf32> to vector<8x1xf32>
    %305 = vector.broadcast %304 : vector<8x1xf32> to vector<8x8xf32>
    %306 = arith.subf %302, %305 : vector<8x8xf32>
    %307 = math.exp %306 : vector<8x8xf32>
    %cst_97 = arith.constant dense<0.000000e+00> : vector<8xf32>
    %308 = vector.multi_reduction <add>, %307, %cst_97 [1] : vector<8x8xf32> to vector<8xf32>
    %309 = vector.shape_cast %308 : vector<8xf32> to vector<8x1xf32>
    %310 = tpu.reciprocal %309 {approx = true} : vector<8x1xf32> -> vector<8x1xf32>
    %311 = vector.broadcast %310 : vector<8x1xf32> to vector<8x8xf32>
    %312 = arith.mulf %307, %311 : vector<8x8xf32>
    %313 = arith.truncf %312 : vector<8x8xf32> to vector<8x8xbf16>
    "tpu.trace_start"() <{level = 10 : i32, message = "qk,kd->qd"}> : () -> ()
    %cst_98 = arith.constant dense<0.000000e+00> : vector<8x32xf32>
    %314 = tpu.matmul %313, %298, %cst_98 {dimension_numbers = #tpu.dot_dimension_numbers<[1], [0], [0], [1], [0, 0, 1, 1], [], []>} : vector<8x8xbf16>, vector<8x32xbf16>, vector<8x32xf32> -> vector<8x32xf32>
    "tpu.trace_stop"() : () -> ()
    %315 = tpu.concatenate %248, %270, %292, %314 in 1 : vector<8x32xf32>, vector<8x32xf32>, vector<8x32xf32>, vector<8x32xf32> -> vector<8x128xf32>
    %316 = arith.truncf %315 : vector<8x128xf32> to vector<8x128xbf16>
    %c1_99 = arith.constant 1 : index
    %c0_100 = arith.constant 0 : index
    %c0_101 = arith.constant 0 : index
    %317 = vector.load %arg5[%c1_99, %c0_100, %c0_101] : memref<2x128x128xbf16, #tpu.memory_space<vmem>>, vector<1x128x128xbf16>
    %318 = vector.shape_cast %317 : vector<1x128x128xbf16> to vector<128x128xbf16>
    %cst_102 = arith.constant dense<0.000000e+00> : vector<8x128xf32>
    %319 = tpu.matmul %316, %318, %cst_102 {dimension_numbers = #tpu.dot_dimension_numbers<[1], [0], [0], [1], [0, 0, 1, 1], [], []>} : vector<8x128xbf16>, vector<128x128xbf16>, vector<8x128xf32> -> vector<8x128xf32>
    %320 = arith.addf %193, %319 : vector<8x128xf32>
    %c1_103 = arith.constant 1 : index
    %c0_104 = arith.constant 0 : index
    %c0_105 = arith.constant 0 : index
    %321 = vector.load %arg6[%c1_103, %c0_104, %c0_105] : memref<2x1x128xf32, #tpu.memory_space<vmem>>, vector<1x1x128xf32>
    %322 = vector.shape_cast %321 : vector<1x1x128xf32> to vector<1x128xf32>
    %323 = arith.mulf %320, %320 : vector<8x128xf32>
    %cst_106 = arith.constant dense<0.000000e+00> : vector<8xf32>
    %324 = vector.multi_reduction <add>, %323, %cst_106 [1] : vector<8x128xf32> to vector<8xf32>
    %325 = vector.shape_cast %324 : vector<8xf32> to vector<8x1xf32>
    %cst_107 = arith.constant 1.280000e+02 : f32
    %326 = vector.broadcast %cst_107 : f32 to vector<8x1xf32>
    %327 = arith.divf %325, %326 : vector<8x1xf32>
    %cst_108 = arith.constant 9.99999974E-6 : f32
    %328 = vector.broadcast %cst_108 : f32 to vector<8x1xf32>
    %329 = arith.addf %327, %328 : vector<8x1xf32>
    %330 = math.rsqrt %329 : vector<8x1xf32>
    %331 = vector.broadcast %330 : vector<8x1xf32> to vector<8x128xf32>
    %332 = arith.mulf %320, %331 : vector<8x128xf32>
    %333 = vector.broadcast %322 : vector<1x128xf32> to vector<8x128xf32>
    %334 = arith.mulf %332, %333 : vector<8x128xf32>
    %335 = arith.truncf %334 : vector<8x128xf32> to vector<8x128xbf16>
    %c1_109 = arith.constant 1 : index
    %c0_110 = arith.constant 0 : index
    %c0_111 = arith.constant 0 : index
    %336 = vector.load %arg7[%c1_109, %c0_110, %c0_111] : memref<2x128x512xbf16, #tpu.memory_space<vmem>>, vector<1x128x512xbf16>
    %337 = vector.shape_cast %336 : vector<1x128x512xbf16> to vector<128x512xbf16>
    %cst_112 = arith.constant dense<0.000000e+00> : vector<8x512xf32>
    %338 = tpu.matmul %335, %337, %cst_112 {dimension_numbers = #tpu.dot_dimension_numbers<[1], [0], [0], [1], [0, 0, 1, 1], [], []>} : vector<8x128xbf16>, vector<128x512xbf16>, vector<8x512xf32> -> vector<8x512xf32>
    %339 = vector.extract_strided_slice %338 {offsets = [0, 0], sizes = [8, 256], strides = [1, 1]} : vector<8x512xf32> to vector<8x256xf32>
    %340 = vector.extract_strided_slice %338 {offsets = [0, 256], sizes = [8, 256], strides = [1, 1]} : vector<8x512xf32> to vector<8x256xf32>
    %341 = arith.negf %339 : vector<8x256xf32>
    %342 = math.exp %341 : vector<8x256xf32>
    %cst_113 = arith.constant 1.000000e+00 : f32
    %343 = vector.broadcast %cst_113 : f32 to vector<8x256xf32>
    %344 = arith.addf %343, %342 : vector<8x256xf32>
    %345 = arith.divf %343, %344 : vector<8x256xf32>
    %346 = arith.mulf %339, %345 : vector<8x256xf32>
    %347 = arith.mulf %346, %340 : vector<8x256xf32>
    %348 = arith.truncf %347 : vector<8x256xf32> to vector<8x256xbf16>
    %c1_114 = arith.constant 1 : index
    %c0_115 = arith.constant 0 : index
    %c0_116 = arith.constant 0 : index
    %349 = vector.load %arg8[%c1_114, %c0_115, %c0_116] : memref<2x256x128xbf16, #tpu.memory_space<vmem>>, vector<1x256x128xbf16>
    %350 = vector.shape_cast %349 : vector<1x256x128xbf16> to vector<256x128xbf16>
    %cst_117 = arith.constant dense<0.000000e+00> : vector<8x128xf32>
    %351 = tpu.matmul %348, %350, %cst_117 {dimension_numbers = #tpu.dot_dimension_numbers<[1], [0], [0], [1], [0, 0, 1, 1], [], []>} : vector<8x256xbf16>, vector<256x128xbf16>, vector<8x128xf32> -> vector<8x128xf32>
    %352 = arith.addf %320, %351 : vector<8x128xf32>
    %c0_118 = arith.constant 0 : index
    %c0_119 = arith.constant 0 : index
    %353 = vector.load %arg9[%c0_118, %c0_119] : memref<1x128xf32, #tpu.memory_space<vmem>>, vector<1x128xf32>
    %354 = arith.mulf %352, %352 : vector<8x128xf32>
    %cst_120 = arith.constant dense<0.000000e+00> : vector<8xf32>
    %355 = vector.multi_reduction <add>, %354, %cst_120 [1] : vector<8x128xf32> to vector<8xf32>
    %356 = vector.shape_cast %355 : vector<8xf32> to vector<8x1xf32>
    %cst_121 = arith.constant 1.280000e+02 : f32
    %357 = vector.broadcast %cst_121 : f32 to vector<8x1xf32>
    %358 = arith.divf %356, %357 : vector<8x1xf32>
    %cst_122 = arith.constant 9.99999974E-6 : f32
    %359 = vector.broadcast %cst_122 : f32 to vector<8x1xf32>
    %360 = arith.addf %358, %359 : vector<8x1xf32>
    %361 = math.rsqrt %360 : vector<8x1xf32>
    %362 = vector.broadcast %361 : vector<8x1xf32> to vector<8x128xf32>
    %363 = arith.mulf %352, %362 : vector<8x128xf32>
    %364 = vector.broadcast %353 : vector<1x128xf32> to vector<8x128xf32>
    %365 = arith.mulf %363, %364 : vector<8x128xf32>
    %cst_123 = arith.constant dense<0.000000e+00> : vector<1xf32>
    %366 = vector.multi_reduction <add>, %3, %cst_123 [1] : vector<1x8xf32> to vector<1xf32>
    %367 = vector.shape_cast %366 : vector<1xf32> to vector<1x1xf32>
    %cst_124 = arith.constant 1.000000e+00 : f32
    %368 = vector.broadcast %cst_124 : f32 to vector<1x1xf32>
    %369 = arith.subf %367, %368 : vector<1x1xf32>
    %370 = tpu.iota {dimensions = array<i32: 0>} : vector<8x1xi32>
    %371 = arith.sitofp %370 : vector<8x1xi32> to vector<8x1xf32>
    %372 = vector.broadcast %369 : vector<1x1xf32> to vector<8x1xf32>
    %373 = arith.cmpf oeq, %371, %372 : vector<8x1xf32>
    %cst_125 = arith.constant 1.000000e+00 : f32
    %cst_126 = arith.constant 0.000000e+00 : f32
    %374 = vector.broadcast %cst_125 : f32 to vector<8x1xf32>
    %375 = vector.broadcast %cst_126 : f32 to vector<8x1xf32>
    %376 = arith.select %373, %374, %375 : vector<8x1xi1>, vector<8x1xf32>
    %377 = vector.broadcast %376 : vector<8x1xf32> to vector<8x128xf32>
    %378 = arith.mulf %365, %377 : vector<8x128xf32>
    %cst_127 = arith.constant dense<0.000000e+00> : vector<128xf32>
    %379 = vector.multi_reduction <add>, %378, %cst_127 [0] : vector<8x128xf32> to vector<128xf32>
    %380 = vector.shape_cast %379 : vector<128xf32> to vector<1x128xf32>
    %c0_128 = arith.constant 0 : index
    %c0_129 = arith.constant 0 : index
    %381 = vector.load %arg10[%c0_128, %c0_129] : memref<128x1xf32, #tpu.memory_space<vmem>>, vector<128x1xf32>
    %cst_130 = arith.constant dense<0.000000e+00> : vector<1x1xf32>
    %382 = tpu.matmul %380, %381, %cst_130 {dimension_numbers = #tpu.dot_dimension_numbers<[1], [0], [0], [1], [0, 0, 1, 1], [], []>} : vector<1x128xf32>, vector<128x1xf32>, vector<1x1xf32> -> vector<1x1xf32>
    %383 = vector.shape_cast %382 : vector<1x1xf32> to vector<1x1x1xf32>
    %c0_131 = arith.constant 0 : index
    %c0_132 = arith.constant 0 : index
    %c0_133 = arith.constant 0 : index
    %384 = vector.load %arg13[%c0_131, %c0_132, %c0_133] : memref<1x1x1xf32, #tpu.memory_space<vmem>>, vector<1x1x1xf32>
    tpu.vector_store %arg13[%c0_131, %c0_132, %c0_133], %383 {strides = array<i32>} : memref<1x1x1xf32, #tpu.memory_space<vmem>>, vector<1x1x1xf32>,
    return
  }
  func.func @transform_0(%arg0: i32) -> (i32, i32, i32) {
    %c0_i32 = arith.constant 0 : i32
    %c0_i32_0 = arith.constant 0 : i32
    %c0_i32_1 = arith.constant 0 : i32
    return %arg0, %c0_i32, %c0_i32_0 : i32, i32, i32
  }
  func.func @transform_1(%arg0: i32) -> (i32, i32, i32) {
    %c0_i32 = arith.constant 0 : i32
    %c0_i32_0 = arith.constant 0 : i32
    %c0_i32_1 = arith.constant 0 : i32
    return %arg0, %c0_i32, %c0_i32_0 : i32, i32, i32
  }
  func.func @transform_2(%arg0: i32) -> (i32, i32, i32) {
    %c0_i32 = arith.constant 0 : i32
    %c0_i32_0 = arith.constant 0 : i32
    %c0_i32_1 = arith.constant 0 : i32
    %c0_i32_2 = arith.constant 0 : i32
    return %c0_i32, %c0_i32_0, %c0_i32_1 : i32, i32, i32
  }
  func.func @transform_3(%arg0: i32) -> (i32, i32, i32) {
    %c0_i32 = arith.constant 0 : i32
    %c0_i32_0 = arith.constant 0 : i32
    %c0_i32_1 = arith.constant 0 : i32
    %c0_i32_2 = arith.constant 0 : i32
    return %c0_i32, %c0_i32_0, %c0_i32_1 : i32, i32, i32
  }
  func.func @transform_4(%arg0: i32) -> (i32, i32, i32) {
    %c0_i32 = arith.constant 0 : i32
    %c0_i32_0 = arith.constant 0 : i32
    %c0_i32_1 = arith.constant 0 : i32
    %c0_i32_2 = arith.constant 0 : i32
    return %c0_i32, %c0_i32_0, %c0_i32_1 : i32, i32, i32
  }
  func.func @transform_5(%arg0: i32) -> (i32, i32, i32) {
    %c0_i32 = arith.constant 0 : i32
    %c0_i32_0 = arith.constant 0 : i32
    %c0_i32_1 = arith.constant 0 : i32
    %c0_i32_2 = arith.constant 0 : i32
    return %c0_i32, %c0_i32_0, %c0_i32_1 : i32, i32, i32
  }
  func.func @transform_6(%arg0: i32) -> (i32, i32, i32) {
    %c0_i32 = arith.constant 0 : i32
    %c0_i32_0 = arith.constant 0 : i32
    %c0_i32_1 = arith.constant 0 : i32
    %c0_i32_2 = arith.constant 0 : i32
    return %c0_i32, %c0_i32_0, %c0_i32_1 : i32, i32, i32
  }
  func.func @transform_7(%arg0: i32) -> (i32, i32, i32) {
    %c0_i32 = arith.constant 0 : i32
    %c0_i32_0 = arith.constant 0 : i32
    %c0_i32_1 = arith.constant 0 : i32
    %c0_i32_2 = arith.constant 0 : i32
    return %c0_i32, %c0_i32_0, %c0_i32_1 : i32, i32, i32
  }
  func.func @transform_8(%arg0: i32) -> (i32, i32) {
    %c0_i32 = arith.constant 0 : i32
    %c0_i32_0 = arith.constant 0 : i32
    %c0_i32_1 = arith.constant 0 : i32
    return %c0_i32, %c0_i32_0 : i32, i32
  }
  func.func @transform_9(%arg0: i32) -> (i32, i32) {
    %c0_i32 = arith.constant 0 : i32
    %c0_i32_0 = arith.constant 0 : i32
    %c0_i32_1 = arith.constant 0 : i32
    return %c0_i32, %c0_i32_0 : i32, i32
  }
  func.func @transform_10(%arg0: i32) -> (i32, i32) {
    %c0_i32 = arith.constant 0 : i32
    %c0_i32_0 = arith.constant 0 : i32
    %c0_i32_1 = arith.constant 0 : i32
    return %c0_i32, %c0_i32_0 : i32, i32
  }
  func.func @transform_11(%arg0: i32) -> (i32, i32) {
    %c0_i32 = arith.constant 0 : i32
    %c0_i32_0 = arith.constant 0 : i32
    %c0_i32_1 = arith.constant 0 : i32
    return %c0_i32, %c0_i32_0 : i32, i32
  }
  func.func @transform_12(%arg0: i32) -> (i32, i32, i32) {
    %c0_i32 = arith.constant 0 : i32
    %c0_i32_0 = arith.constant 0 : i32
    %c0_i32_1 = arith.constant 0 : i32
    return %arg0, %c0_i32, %c0_i32_0 : i32, i32, i32
  }
}

</mosaic_0001>

<bundles_post_ra>
// kernel: tile.19
= control target key start
LH: loop header
LB: loop body
LE: loop exit
PB: predicated region body
PF: predicated region fallthrough
CT: control target
= control target key end

     0   :  { %vm42_vm0 = vcmask 1047556   ;;  %vm44_vm1 = vcmask 261120   ;;  %s93_s22 = smov 32   ;;  %s94_s25 = smov 64   ;;  %vm54_vm2 = vcmask 1048320   ;;  %vm64_vm3 = vcmask 785920   ;;  %s146_s0 = inlined_call_operand.vmem [shape: f32[8,4,32], index: 0, kind: input, shape index: {}]   ;;  %s147_s1 = inlined_call_operand.vmem [shape: f32[8,128], index: 1, kind: output, shape index: {}]  }
   0x1   :  { %v82_v0 = vld [vmem:[%s146_s0 + $0x1c] sm:$0xf]  ;;  %v83_v1 = vld [vmem:[%s146_s0 + $0x18] sm:$0xf]  ;;  %v84_v2 = vld [vmem:[%s146_s0 + $0x14] sm:$0xf] }
   0x2   :  { %8 = vst [vmem:[#allocation0 + $0x38] sm:$0xf] %v82_v0  ;;  %13 = vst [vmem:[#allocation0 + $0x30] sm:$0xf] %v83_v1  ;;  %v85_v3 = vld [vmem:[%s146_s0 + $0x10] sm:$0xf] }
   0x3   :  { %18 = vst [vmem:[#allocation0 + $0x28] sm:$0xf] %v84_v2  ;;  %v86_v4 = vld [vmem:[%s146_s0 + $0xc] sm:$0xf]  ;;  %v87_v5 = vld [vmem:[%s146_s0 + $0x8] sm:$0xf] }
   0x4   :  { %23 = vst [vmem:[#allocation0 + $0x20] sm:$0xf] %v85_v3  ;;  %28 = vst [vmem:[#allocation0 + $0x18] sm:$0xf] %v86_v4  ;;  %v88_v6 = vld [vmem:[%s146_s0 + $0x4] sm:$0xf] }
   0x5   :  { %33 = vst [vmem:[#allocation0 + $0x10] sm:$0xf] %v87_v5  ;;  %v38_v7 = vld [vmem:[%s146_s0] sm:$0xf]  ;;  %37 = vst [vmem:[#allocation0 + $0x8] sm:$0xf] %v88_v6 }
   0x6   :  { %39 = vst [vmem:[#allocation0] sm:$0xf] %v38_v7  ;;  %s92_s0 = smov 96   ;;  %vm74_vm4 = vcmask 523520  }
   0xb   :  { %v49_v8 = vld [vmem:[#allocation0 + $0x3] ss:$8 sm:$0xf0]   ;;  %v59_v9 = vld [vmem:[#allocation0 + $0x2] ss:$8 sm:$0xf0]  }
   0xc   :  { %v69_v14 = vld [vmem:[#allocation0 + $0x1] ss:$8 sm:$0xf0]   ;;  %v41_v17 = vld [vmem:[#allocation0] ss:$8 sm:$0xf0]  }
   0xd   :  { %v47_v10 = vld [vmem:[#allocation0 + $0x3] ss:$8 sm:$0xf]   ;;  %v57_v11 = vld [vmem:[#allocation0 + $0x2] ss:$8 sm:$0xf]  }
   0xe   :  { %v51_v12 = vsel %vm42_vm0, %v49_v8, %v47_v10  ;;  %v67_v13 = vld [vmem:[#allocation0 + $0x1] ss:$8 sm:$0xf]   ;;  %v40_v16 = vld [vmem:[#allocation0] ss:$8 sm:$0xf]   ;;  %v61_v18 = vsel %vm42_vm0, %v59_v9, %v57_v11 }
   0xf   :  { %52 = vrot.lane.b32.xlu0 %v51_v12, %s92_s0  ;;  %v71_v15 = vsel %vm42_vm0, %v69_v14, %v67_v13  ;;  %v43_v19 = vsel %vm42_vm0, %v41_v17, %v40_v16 }
  0x10   :  { %72 = vrot.lane.b32.xlu1 %v71_v15, %s93_s22  ;;  %45 = vst.msk [vmem:[%s147_s1] sm:$0xff] %vm44_vm1, %v43_v19  }
  0x13   :  { %62 = vrot.lane.b32.xlu0 %v61_v18, %s94_s25 }
  0x81   :  { %v53_v20 = vpop.permute.xlu0 %52  }
  0x82   :  { %55 = vst.msk [vmem:[%s147_s1] sm:$0xff] %vm54_vm2, %v53_v20   ;;  %v73_v21 = vpop.permute.xlu1 %72  }
  0x85   :  { %v63_v22 = vpop.permute.xlu0 %62  }
  0x86   :  { %65 = vst.msk [vmem:[%s147_s1] sm:$0xff] %vm64_vm3, %v63_v22  }
  0x87   :  { %75 = vst.msk [vmem:[%s147_s1] sm:$0xff] %vm74_vm4, %v73_v21  }

// kernel: _forward.1
= control target key start
LH: loop header
LB: loop body
LE: loop exit
PB: predicated region body
PF: predicated region fallthrough
CT: control target
= control target key end

     0   :  { %17 = vsyncpa [#allocation3], 0  ;;  %s5126_s0 = inlined_call_operand.vmem [shape: f32[2,8,128], index: 0, kind: input, shape index: {}]   ;;  %s5127_s1 = inlined_call_operand.vmem [shape: f32[2,1,8], index: 1, kind: input, shape index: {}]   ;;  %s5128_s2 = inlined_call_operand.vmem [shape: f32[2,1,128], index: 2, kind: input, shape index: {}]   ;;  %s5129_s3 = inlined_call_operand.hbm [shape: bf16[2,128,384], index: 3, kind: input, shape index: {}]   ;;  %s5130_s4 = inlined_call_operand.hbm [shape: bf16[2,128,128], index: 4, kind: input, shape index: {}]   ;;  %s5131_s5 = inlined_call_operand.vmem [shape: f32[2,1,128], index: 5, kind: input, shape index: {}]   ;;  %s5132_s6 = inlined_call_operand.vmem [shape: bf16[2,128,512], index: 6, kind: input, shape index: {}]   ;;  %s5133_s7 = inlined_call_operand.hbm [shape: bf16[2,256,128], index: 7, kind: input, shape index: {}]   ;;  %s5134_s8 = inlined_call_operand.vmem [shape: f32[1,128], index: 8, kind: input, shape index: {}]   ;;  %s5135_s9 = inlined_call_operand.vmem [shape: f32[128,1], index: 9, kind: input, shape index: {}]   ;;  %s5136_s10 = inlined_call_operand.vmem [shape: f32[8,128], index: 10, kind: input, shape index: {}]   ;;  %s5137_s11 = inlined_call_operand.vmem [shape: f32[8,128], index: 11, kind: input, shape index: {}]   ;;  %s5138_s12 = inlined_call_operand.vmem [shape: f32[2,1,1], index: 12, kind: output, shape index: {}]  }
   0x1   :  { %18 = vsyncpa [#allocation5], 0  ;;  %s4457_s21 = smov 0  }
   0x2 LB: > { %5145 = sst [smem:[#allocation9_spill]] %s4373_s21  ;;  %s4375_s22 = smov [#allocation4]   ;;  %s4373_s21 = sphi %s4457_s21, %s24_s21  }
   0x3   : > { %s345_s23 = sshll.u32 %s4375_s22, 4  ;;  %s4463_s24 = sadd.s32 4294967295, %s4373_s21   ;;  %s4472_s23 = int_to_ptr.vmem [resolvable:$true] %s345_s23 }
   0x4   : > { %p3358_p0 = scmp.ge.s32.totalorder %s4373_s21, 1  ;;  %p317_p1 = scmp.lt.s32.totalorder %s4373_s21, 3 }
   0x5   : > { %p5141_p2 = scmp.eq.s32.totalorder %s4463_s24, 0  ;;  %s4376_s26 = smov [#allocation2]  }
   0x6   : > { %p4468_p3 = pnand %p3358_p0, %p317_p1  ;;  %s332_s27 = sshll.u32 %s4376_s26, 4  ;;  %s4476_s27 = int_to_ptr.vmem [resolvable:$true] %s332_s27 }
   0x7   : > { %s4377_s29 = smov [#allocation6]   ;;  %s4275_s15 = scalar_lea.hbm %s5130_s4, 2048 }
   0x8   : > { %s5146_s25 = scalar_select %p4468_p3, 1, 0 }
   0x9   : > { %p3966_p4 = pneg %p4468_p3  ;;  %s4484_s30 = sshll.u32 %s4377_s29, 4  ;;  %s365_s30 = int_to_ptr.vmem [resolvable:$true] %s4484_s30 }
   0xa   : > { %p4276_p6 = scmp.ne.s32.totalorder %s5130_s4, %s4275_s15  ;;  %p4282_p10 = scmp.lt.u32.totalorder %s4275_s15, %s5130_s4 }
   0xb   : > { %p4480_p5 = pnand %p5141_p2, %p3966_p4 }
   0xd   : > { %p4494_p7 = pneg %p4480_p5 }
   0xf   : > { %p4278_p8 = pnand %p4494_p7, %p4276_p6 }
  0x11   : > { %p4279_p9 = pneg %p4278_p8 }
  0x13   : > { %p4284_p11 = pnand %p4282_p10, %p4279_p9 }
  0x15   : > { %4287 = shalt.err (!%p4284_p11)
}
  0x16   : > { %s4288_s22 = scalar_lea.vmem %s4472_s23, 2048  ;;  %p4296_p1 = scmp.lt.s32.totalorder %s4472_s23, %s4472_s23 }
  0x17   : > { %p4289_p12 = scmp.ne.s32.totalorder %s4472_s23, %s4288_s22  ;;  %p4297_p4 = scmp.lt.s32.totalorder %s4288_s22, %s4288_s22 }
  0x19   : > { %p4291_p13 = pnand %p4289_p12, %p4494_p7  ;;  %p4298_p6 = por %p4297_p4, %p4296_p1 }
  0x1b   : > { %p4292_p0 = pneg %p4291_p13 }
  0x1d   : > { %p4299_p8 = pnand %p4298_p6, %p4292_p0 }
  0x1f   : > { %4302 = shalt.err (!%p4299_p8)
}
  0x20   : > { %s5140_s26 = smov 64   ;;  %s4379_s29 = smov 4  }
  0x21   : > { %3972 = dma.hbm_to_vmem [thread:$0]  (!%p4480_p5), %s5130_s4, 2048, %s4472_s23, [#allocation5], %s5140_s26, %s5140_s26, %s4379_s29  }
  0x22   : > { %s4303_s17 = scalar_lea.hbm %s5129_s3, 6144 }
  0x23   : > { %p4304_p9 = scmp.ne.s32.totalorder %s5129_s3, %s4303_s17  ;;  %p4310_p12 = scmp.lt.u32.totalorder %s4303_s17, %s5129_s3 }
  0x25   : > { %p4306_p10 = pnand %p4304_p9, %p4494_p7 }
  0x27   : > { %p4307_p11 = pneg %p4306_p10 }
  0x29   : > { %p4312_p13 = pnand %p4310_p12, %p4307_p11 }
  0x2b   : > { %4315 = shalt.err (!%p4312_p13)
}
  0x2c   : > { %s4316_s23 = scalar_lea.vmem %s4476_s27, 6144  ;;  %p4324_p6 = scmp.lt.s32.totalorder %s4476_s27, %s4476_s27 }
  0x2d   : > { %p4317_p0 = scmp.ne.s32.totalorder %s4476_s27, %s4316_s23  ;;  %p4325_p8 = scmp.lt.s32.totalorder %s4316_s23, %s4316_s23 }
  0x2f   : > { %p4319_p1 = pnand %p4317_p0, %p4494_p7  ;;  %p4326_p9 = por %p4325_p8, %p4324_p6 }
  0x31   : > { %p4320_p4 = pneg %p4319_p1 }
  0x33   : > { %p4327_p10 = pnand %p4326_p9, %p4320_p4 }
  0x35   : > { %4330 = shalt.err (!%p4327_p10)
}
  0x36   : > { %s4380_s13 = smov 192   ;;  %s4381_s21 = smov 12  }
  0x37   : > { %3969 = dma.hbm_to_vmem [thread:$0]  (!%p4480_p5), %s5129_s3, 6144, %s4476_s27, [#allocation3], %s4380_s13, %s4380_s13, %s4381_s21  }
  0x38   : > { %s4331_s19 = scalar_lea.hbm %s5133_s7, 4096 }
  0x39   : > { %p4332_p11 = scmp.ne.s32.totalorder %s5133_s7, %s4331_s19  ;;  %p4338_p0 = scmp.lt.u32.totalorder %s4331_s19, %s5133_s7 }
  0x3b   : > { %p4334_p12 = pnand %p4332_p11, %p4494_p7 }
  0x3d   : > { %p4335_p13 = pneg %p4334_p12 }
  0x3f   : > { %p4340_p1 = pnand %p4338_p0, %p4335_p13 }
  0x41   : > { %4343 = shalt.err (!%p4340_p1)
}
  0x42   : > { %s4344_s14 = scalar_lea.vmem %s365_s30, 4096  ;;  %p4352_p9 = scmp.lt.s32.totalorder %s365_s30, %s365_s30 }
  0x43   : > { %p4345_p4 = scmp.ne.s32.totalorder %s365_s30, %s4344_s14  ;;  %p4353_p10 = scmp.lt.s32.totalorder %s4344_s14, %s4344_s14 }
  0x45   : > { %p4347_p6 = pnand %p4345_p4, %p4494_p7  ;;  %p4354_p2 = por %p4353_p10, %p4352_p9 }
  0x47   : > { %p4348_p8 = pneg %p4347_p6 }
  0x49   : > { %p4355_p3 = pnand %p4354_p2, %p4348_p8 }
  0x4b   : > { %4358 = shalt.err (!%p4355_p3)
}
  0x4c   : > { %s5149_s27 = smov 64   ;;  %p5150_p11 = scmp.ne.s32.totalorder %s5146_s25, 0 }
  0x4d   : > { %3975 = dma.hbm_to_vmem [thread:$0]  (!%p4480_p5), %s5133_s7, 4096, %s365_s30, [#allocation5], %s5149_s27, %s5149_s27, %s4379_s29  }
  0x4e   : > { %405 = sbr.rel (%p5150_p11) target bundleno = 5597 (0x15dd), region = 68  ;;  %p5151_p7 = scmp.eq.s32.totalorder (!%p5150_p11), %s4463_s24, 0 }
  0x55   : > { %4364 = dma.done.wait (%p5151_p7), [#allocation3], 6144   ;;  %p5152_p12 = pmov %p5151_p7 }
  0x56   : > { %p5153_p2 = pmov %p5151_p7 }
  0x57   : > { %4366 = vsyncadd (%p5152_p12), [#allocation3], 4294961152 }
  0x58   : > { %4368 = dma.done.wait (%p5153_p2), [#allocation5], 6144   ;;  %p5154_p3 = pmov %p5153_p2 }
  0x59   : > { %p455_p13 = scmp.lt.s32.totalorder %s4463_s24, 1  ;;  %v4382_v0 = vmov 0.0   ;;  %v4007_v3 = vld [vmem:[#allocation2 + $0x4] ss:$12 sps:$4 sm:$0xff]   ;;  %v4009_v4 = vld [vmem:[#allocation2] ss:$12 sps:$4 sm:$0xff]   ;;  %v468_v44 = vlaneseq }
  0x5a   : > { %4370 = vsyncadd (%p5154_p3), [#allocation5], 4294961152  ;;  %3719 = vmatprep.subr.bf16.mxu1 %v4382_v0  ;;  %v4010_v5 = vld [vmem:[#allocation2 + $0x8] ss:$12 sps:$4 sm:$0xff]   ;;  %674 = vmatprep.subr.bf16.mxu0 %v4007_v3  ;;  %v4013_v7 = vld [vmem:[#allocation2 + $0x18] ss:$12 sps:$4 sm:$0xff]  }
  0x5b   : > { %s5160_s24 = smov (!%p455_p13, %s4463_s24), 1  ;;  %v4011_v6 = vld [vmem:[#allocation2 + $0x1c] ss:$12 sps:$4 sm:$0xff]   ;;  %675 = vmatpush1.bf16.msra.mxu0 %v4009_v4  ;;  %3720 = vmatpush3.bf16.msra.mxu1 %v4010_v5  ;;  %v4014_v8 = vld [vmem:[#allocation2 + $0x20] ss:$12 sps:$4 sm:$0xff]   ;;  %v4383_v24 = vmov 0  }
  0x5c   : > { %s3367_s25 = sshll.u32 %s5160_s24, 3  ;;  %676 = vmatprep.subr.bf16.mxu0 %v4011_v6  ;;  %3721 = vmatprep.subr.bf16.mxu1 %v4382_v0  ;;  %v4015_v9 = vld [vmem:[#allocation2 + $0x34] ss:$12 sps:$4 sm:$0xff]   ;;  %v4017_v10 = vld [vmem:[#allocation2 + $0x30] ss:$12 sps:$4 sm:$0xff]   ;;  %vm4384_vm0 = vmmov 0   ;;  %s4649_s27 = scalar_lea.vmem %s5127_s1, %s5160_s24 }
  0x5d   : > { %s4582_s18 = scalar_lea.vmem %s5126_s0, %s3367_s25  ;;  %v4018_v11 = vld [vmem:[#allocation2 + $0x38] ss:$12 sps:$4 sm:$0xff]   ;;  %v4021_v13 = vld [vmem:[#allocation2 + $0x48] ss:$12 sps:$4 sm:$0xff]   ;;  %v4022_v14 = vld [vmem:[#allocation2 + $0x50] ss:$12 sps:$4 sm:$0xff]   ;;  %706 = vmatprep.mubr.bf16.mxu0 %v4383_v24  ;;  %3735 = vmatprep.mubr.msk.bf16.mxu1 %vm4384_vm0, %v4382_v0  ;;  %s464_s14 = scalar_lea.vmem %s5138_s12, %s5160_s24 }
  0x5e   : > { %v4585_v1 = vld [vmem:[%s4582_s18] sm:$0xff]  ;;  %v4019_v12 = vld [vmem:[#allocation2 + $0x4c] ss:$12 sps:$4 sm:$0xff]   ;;  %v4026_v17 = vld [vmem:[#allocation2 + $0x68] ss:$12 sps:$4 sm:$0xff]   ;;  %s4385_s15 = smov 16  }
  0x5f   : > { %v498_v2 = vmul.f32 %v4585_v1, %v4585_v1  ;;  %677 = vmatpush1.bf16.msra.mxu0 %v4013_v7  ;;  %3722 = vmatpush3.bf16.msra.mxu1 %v4014_v8  ;;  %v4023_v15 = vld [vmem:[#allocation2 + $0x64] ss:$12 sps:$4 sm:$0xff]   ;;  %v4025_v16 = vld [vmem:[#allocation2 + $0x60] ss:$12 sps:$4 sm:$0xff]   ;;  %v4027_v18 = vld [vmem:[#allocation2 + $0x7c] ss:$12 sps:$4 sm:$0xff]  }
  0x60   : > { %678 = vmatprep.subr.bf16.mxu0 %v4015_v9  ;;  %3723 = vmatprep.subr.bf16.mxu1 %v4382_v0  ;;  %v4029_v19 = vld [vmem:[#allocation2 + $0x78] ss:$12 sps:$4 sm:$0xff]   ;;  %v4030_v20 = vld [vmem:[#allocation2 + $0x80] ss:$12 sps:$4 sm:$0xff]   ;;  %v4033_v22 = vld [vmem:[#allocation2 + $0x90] ss:$12 sps:$4 sm:$0xff]  }
  0x61   : > { %499 = vadd.xlane.f32.xlu0 %v498_v2  ;;  %v4031_v21 = vld [vmem:[#allocation2 + $0x94] ss:$12 sps:$4 sm:$0xff]   ;;  %v4034_v23 = vld [vmem:[#allocation2 + $0x98] ss:$12 sps:$4 sm:$0xff]   ;;  %v4038_v27 = vld [vmem:[#allocation2 + $0xb0] ss:$12 sps:$4 sm:$0xff]  }
  0x62   : > { %v4035_v25 = vld [vmem:[#allocation2 + $0xac] ss:$12 sps:$4 sm:$0xff]   ;;  %v4037_v26 = vld [vmem:[#allocation2 + $0xa8] ss:$12 sps:$4 sm:$0xff]   ;;  %v3368_v32 = vld [vmem:[%s5128_s2] ss:$0 sm:$0xff] }
  0x63   : > { %679 = vmatpush1.bf16.msra.mxu0 %v4017_v10  ;;  %3724 = vmatpush3.bf16.msra.mxu1 %v4018_v11  ;;  %s4386_s16 = smov 112   ;;  %v471_v45 = vand.u32 127, %v468_v44  ;;  %v4620_v48 = vld [vmem:[%s5136_s10] sm:$0xff]  ;;  %vm774_vm2 = vcmask 261120   ;;  %vm839_vm3 = vcmask 1043456   ;;  %v4652_v5 = vshrl.u32 %v468_v44, 7 }
  0x64   : > { %3725 = vmatprep.subr.bf16.mxu1 %v4382_v0  ;;  %680 = vmatprep.subr.bf16.mxu0 %v4019_v12  ;;  %v4625_v49 = vld [vmem:[%s5137_s11] sm:$0xff]  ;;  %v4387_v9 = vmov -1e+09   ;;  %vm823_vm8 = vcmask 64512   ;;  %s4388_s26 = smov 96   ;;  %s4389_s13 = smov 64  }
  0x65   : > { %v488_v46 = vand.u32 31, %v471_v45  ;;  %v467_v4 = vld [vmem:[%s4649_s27] sm:$0x1]  ;;  %v477_v6 = vsub.s32 0, %v4652_v5  ;;  %vm472_vm5 = vcmp.le.s32.totalorder %v471_v45, %v4652_v5  ;;  %s5143_s25 = smov 32   ;;  %vm1235_vm9 = vcmask 523264  }
  0x66   : > { %vm473_vm4 = vcmp.gt.f32.partialorder %v467_v4, 0.5  ;;  %vm1237_vm10 = vcmask 785408   ;;  %vm3162_vm11 = vcmask 57344   ;;  %vm3267_vm13 = vcmask 0  }
  0x67   : > { %681 = vmatpush1.bf16.msra.mxu0 %v4021_v13  ;;  %3726 = vmatpush3.bf16.msra.mxu1 %v4022_v14  ;;  %vm4613_vm1 = vcmp.lt.s32.totalorder %v488_v46, 16  ;;  %v474_v7 = vsel %vm473_vm4, 1, %v4383_v24 }
  0x68   : > { %3727 = vmatprep.subr.bf16.mxu1 %v4382_v0  ;;  %682 = vmatprep.subr.bf16.mxu0 %v4023_v15  ;;  %v478_v8 = vrot.slane %v474_v7, %v477_v6 }
  0x6a   : > { %vm479_vm6 = vcmp.eq.s32.totalorder %v478_v8, 1 }
  0x6b   : > { %683 = vmatpush1.bf16.msra.mxu0 %v4025_v16  ;;  %3728 = vmatpush3.bf16.msra.mxu1 %v4026_v17  ;;  %vm480_vm7 = vmand %vm472_vm5, %vm479_vm6 }
  0x6c   : > { %684 = vmatprep.subr.bf16.mxu0 %v4027_v18  ;;  %3729 = vmatprep.subr.bf16.mxu1 %v4382_v0  ;;  %v4659_v10 = vsel %vm480_vm7, 0.0, %v4387_v9 }
  0x6f   : > { %685 = vmatpush1.bf16.msra.mxu0 %v4029_v19  ;;  %3730 = vmatpush3.bf16.msra.mxu1 %v4030_v20 }
  0x70   : > { %686 = vmatprep.subr.bf16.mxu0 %v4031_v21  ;;  %3731 = vmatprep.subr.bf16.mxu1 %v4382_v0 }
  0x73   : > { %687 = vmatpush1.bf16.msra.mxu0 %v4033_v22  ;;  %3732 = vmatpush3.bf16.msra.mxu1 %v4034_v23 }
  0x74   : > { %688 = vmatprep.subr.bf16.mxu0 %v4035_v25  ;;  %3733 = vmatprep.subr.bf16.mxu1 %v4382_v0 }
  0x77   : > { %689 = vmatpush1.bf16.msra.mxu0 %v4037_v26  ;;  %3734 = vmatpush3.bf16.msra.mxu1 %v4038_v27 }
  0x78   : > { %3739 = vmatprep.subr.bf16.mxu1 %v4382_v0  ;;  %3763 = vmatprep.subr.bf16.mxu0 %v4382_v0 }
  0xee   : > { %v500_v28 = vpop.xlane.xlu0 %499 }
  0xef   : > { %v502_v29 = vmul.f32 0.0078125, %v500_v28 }
  0xf1   : > { %v503_v30 = vadd.f32 1e-05, %v502_v29 }
  0xf3   : > { %4215 = vrsqrt.f32 %v503_v30 }
  0xfd   : > { %v4216_v31 = vpop.eup %4215 }
  0xfe   : > { %v505_v33 = vmul.f32 %v4216_v31, %v4585_v1 }
 0x100   : > { %v512_v34 = vmul.f32 %v3368_v32, %v505_v33 }
 0x102   : > { %v513_v35 = vpack.c.bf16 %v512_v34, %v512_v34 }
 0x104   : > { %707 = vmatmul.mubr.bf16.vlgmr.msra.gmra.mrb[0].mxu0 %v513_v35  ;;  %3736 = vmatmul.mubr.bf16.vlgmr.msra.gmra.mrb[0].mxu1 %v513_v35 }
 0x105   : > { %3741 = vmatprep.mubr.msk.bf16.mxu1 %vm4384_vm0, %v4382_v0  ;;  %3765 = vmatprep.mubr.msk.bf16.mxu0 %vm4384_vm0, %v4382_v0 }
 0x1d7   : > { %v708_v36 = vpop.f32.mrb[0].mxu0  ;;  %v749_v37 = vpop.f32.mrb[0].mxu1 }
 0x1d8   : > { %v710_v38 = vpop.f32.mrb[1].mxu0  ;;  %v3737_v39 = vpop.f32.mrb[1].mxu1  ;;  %v760_v61 = vmul.f32 %v708_v36, %v4620_v48  ;;  %v4637_v63 = vpack.c.bf16 %v749_v37, %v749_v37 }
 0x1d9   : > { %v752_v40 = vpop.f32.mrb[2].mxu1  ;;  %765 = vrot.lane.b32.xlu1 %v710_v38, %s4385_s15  ;;  %763 = vrot.lane.b32.xlu0 %v710_v38, %s4386_s16  ;;  %v712_v41 = vpop.f32.mrb[2].mxu0  ;;  %v768_v53 = vmul.f32 %v710_v38, %v4620_v48 }
 0x1da   : > { %v713_v42 = vpop.f32.mrb[3].mxu0  ;;  %v3738_v43 = vpop.f32.mrb[3].mxu1  ;;  %v841_v3 = vsel %vm839_vm3, %v4637_v63, 0 }
 0x1dd   : > { %755 = vrot.lane.b32.xlu1 %v708_v36, %s4386_s16 }
 0x1e1   : > { %757 = vrot.lane.b32.xlu1 %v708_v36, %s4385_s15 }
 0x24b   : > { %v766_v50 = vpop.permute.xlu1 %765  ;;  %v764_v51 = vpop.permute.xlu0 %763 }
 0x24c   : > { %v767_v52 = vsel %vm4613_vm1, %v764_v51, %v766_v50 }
 0x24d   : > { %v769_v54 = vmul.f32 %v767_v52, %v4625_v49 }
 0x24f   : > { %v770_v55 = vadd.f32 %v769_v54, %v768_v53  ;;  %v756_v56 = vpop.permute.xlu1 %755 }
 0x251   : > { %v772_v57 = vpack.c.bf16 %v770_v55, %v770_v55 }
 0x253   : > { %v758_v58 = vpop.permute.xlu1 %757  ;;  %v779_v59 = vsel %vm774_vm2, %v772_v57, 0 }
 0x254   : > { %v759_v60 = vsel %vm4613_vm1, %v756_v56, %v758_v58  ;;  %3740 = vmatpush3.bf16.xpose.msra.mxu1 %v779_v59 }
 0x255   : > { %v761_v62 = vmul.f32 %v759_v60, %v4625_v49  ;;  %3745 = vmatprep.subr.bf16.mxu1 %v4382_v0 }
 0x257   : > { %v762_v1 = vadd.f32 %v761_v62, %v760_v61 }
 0x259   : > { %v771_v2 = vpack.c.bf16 %v762_v1, %v762_v1 }
 0x25b   : > { %3742 = vmatmul.mubr.msk.bf16.vlgmr.msra.gmra.mrb[4].mxu1 %vm774_vm2, %v771_v2 }
 0x25c   : > { %3746 = vmatpush3.bf16.msra.mxu1 %v841_v3  ;;  %3747 = vmatprep.mubr.msk.bf16.mxu1 %vm4384_vm0, %v4382_v0 }
 0x25d   : > { %3751 = vmatprep.subr.bf16.mxu1 %v4382_v0 }
 0x32e   : > { %v815_v11 = vpop.f32.mrb[4].mxu1 }
 0x32f   : > { %v821_v12 = vmul.f32 0.17677669, %v815_v11  ;;  %v3743_v13 = vpop.f32.mrb[5].mxu1 }
 0x330   : > { %v818_v14 = vpop.f32.mrb[6].mxu1 }
 0x331   : > { %v3744_v15 = vpop.f32.mrb[7].mxu1  ;;  %v822_v16 = vadd.f32 %v821_v12, %v4659_v10 }
 0x333   : > { %v824_v17 = vsel %vm823_vm8, %v822_v16, -inf }
 0x334   : > { %825 = vmax.xlane.f32.xlu1 %v824_v17 }
 0x345   : > { %887 = vrot.lane.b32.xlu1 %v772_v57, %s4388_s26 }
 0x349   : > { %1000 = vrot.lane.b32.xlu1 %v772_v57, %s4389_s13 }
 0x34d   : > { %998 = vrot.lane.b32.xlu1 %v771_v2, %s4389_s13 }
 0x351   : > { %1112 = vrot.lane.b32.xlu1 %v772_v57, %s5143_s25 }
 0x355   : > { %1110 = vrot.lane.b32.xlu1 %v771_v2, %s5143_s25 }
 0x3c1   : > { %v826_v18 = vpop.xlane.xlu1 %825 }
 0x3c2   : > { %v827_v19 = vsub.f32 %v822_v16, %v826_v18 }
 0x3c4   : > { %v828_v20 = vmul.f32 1.442695, %v827_v19 }
 0x3c5   : > { %v888_v21 = vpop.permute.xlu1 %887 }
 0x3c6   : > { %4217 = vpow2.f32 %v828_v20  ;;  %v893_v35 = vsel %vm774_vm2, %v888_v21, 0 }
 0x3c9   : > { %v1001_v22 = vpop.permute.xlu1 %1000 }
 0x3ca   : > { %v1006_v23 = vsel %vm774_vm2, %v1001_v22, 0 }
 0x3cb   : > { %3764 = vmatpush3.bf16.xpose.msra.mxu0 %v1006_v23 }
 0x3cc   : > { %3775 = vmatprep.subr.bf16.mxu0 %v4382_v0 }
 0x3cd   : > { %v999_v25 = vpop.permute.xlu1 %998 }
 0x3d0   : > { %v4218_v26 = vpop.eup %4217 }
 0x3d1   : > { %v1113_v27 = vpop.permute.xlu1 %1112  ;;  %v830_v28 = vsel %vm823_vm8, %v4218_v26, 0.0 }
 0x3d2   : > { %v1118_v29 = vsel %vm774_vm2, %v1113_v27, 0  ;;  %831 = vadd.xlane.f32.xlu0 %v830_v28  ;;  %3766 = vmatmul.mubr.msk.bf16.vlgmr.msra.gmra.mrb[4].mxu0 %vm774_vm2, %v999_v25 }
 0x3d3   : > { %3776 = vmatpush3.bf16.xpose.msra.mxu0 %v1118_v29  ;;  %3777 = vmatprep.mubr.msk.bf16.mxu0 %vm4384_vm0, %v4382_v0 }
 0x3d4   : > { %3787 = vmatprep.subr.bf16.mxu0 %v4382_v0 }
 0x3d5   : > { %v1111_v30 = vpop.permute.xlu1 %1110 }
 0x3da   : > { %3778 = vmatmul.mubr.msk.bf16.vlgmr.msra.gmra.mrb[8].mxu0 %vm774_vm2, %v1111_v30 }
 0x3db   : > { %3803 = vmatprep.mubr.msk.bf16.mxu0 %vm4384_vm0, %v4382_v0 }
 0x3e8   : > { %884 = vrot.lane.b32.xlu0 %v771_v2, %s4388_s26 }
 0x45f   : > { %v832_v31 = vpop.xlane.xlu0 %831 }
 0x460   : > { %4219 = vrcp.f32 %v832_v31 }
 0x463   : > { %v885_v36 = vpop.permute.xlu0 %884 }
 0x46a   : > { %v4220_v32 = vpop.eup %4219 }
 0x46b   : > { %v834_v33 = vmul.f32 %v4220_v32, %v4218_v26 }
 0x46d   : > { %v835_v34 = vpack.c.bf16 %v834_v33, %v834_v33 }
 0x46f   : > { %3748 = vmatmul.mubr.msk.bf16.vlgmr.msra.gmra.mrb[8].mxu1 %vm823_vm8, %v835_v34 }
 0x470   : > { %3752 = vmatpush3.bf16.xpose.msra.mxu1 %v893_v35  ;;  %3753 = vmatprep.mubr.msk.bf16.mxu1 %vm4384_vm0, %v4382_v0 }
 0x471   : > { %3757 = vmatprep.subr.bf16.mxu1 %v4382_v0 }
 0x477   : > { %3754 = vmatmul.mubr.msk.bf16.vlgmr.msra.gmra.mrb[12].mxu1 %vm774_vm2, %v885_v36 }
 0x478   : > { %3759 = vmatprep.mubr.msk.bf16.mxu1 %vm4384_vm0, %v4382_v0 }
 0x4a5   : > { %v1042_v37 = vpop.f32.mrb[4].mxu0 }
 0x4a6   : > { %v1048_v38 = vmul.f32 0.17677669, %v1042_v37  ;;  %v3767_v39 = vpop.f32.mrb[5].mxu0 }
 0x4a7   : > { %v1045_v40 = vpop.f32.mrb[6].mxu0  ;;  %v4039_v39 = vld [vmem:[#allocation4] sm:$0xff]  }
 0x4a8   : > { %v3768_v41 = vpop.f32.mrb[7].mxu0  ;;  %v1049_v42 = vadd.f32 %v1048_v38, %v4659_v10  ;;  %3788 = vmatpush3.bf16.msra.mxu0 %v4039_v39  ;;  %v4040_v40 = vld [vmem:[#allocation4 + $0x8] sm:$0xff]   ;;  %v4077_v39 = vld [vmem:[%s5132_s6 + $0xa0] ss:$16 sps:$4 sm:$0xff]  }
 0x4a9   : > { %3789 = vmatprep.subr.bf16.mxu0 %v4382_v0  ;;  %v4041_v41 = vld [vmem:[#allocation4 + $0x10] sm:$0xff]  }
 0x4aa   : > { %v1050_v43 = vsel %vm823_vm8, %v1049_v42, -inf }
 0x4ab   : > { %1051 = vmax.xlane.f32.xlu1 %v1050_v43  ;;  %v4043_v43 = vld [vmem:[#allocation4 + $0x20] sm:$0xff]  }
 0x4ac   : > { %3790 = vmatpush3.bf16.msra.mxu0 %v4040_v40  ;;  %v4080_v40 = vld [vmem:[%s5132_s6 + $0xa8] ss:$16 sps:$4 sm:$0xff]  }
 0x4ad   : > { %v1154_v44 = vpop.f32.mrb[8].mxu0  ;;  %3791 = vmatprep.subr.bf16.mxu0 %v4382_v0 }
 0x4ae   : > { %v3779_v45 = vpop.f32.mrb[9].mxu0  ;;  %v1160_v61 = vmul.f32 0.17677669, %v1154_v44  ;;  %v4044_v44 = vld [vmem:[#allocation4 + $0x28] sm:$0xff]  }
 0x4af   : > { %v1157_v46 = vpop.f32.mrb[10].mxu0  ;;  %v4045_v45 = vld [vmem:[#allocation4 + $0x30] sm:$0xff]  }
 0x4b0   : > { %v3780_v50 = vpop.f32.mrb[11].mxu0  ;;  %v1161_v8 = vadd.f32 %v1160_v61, %v4659_v10  ;;  %3792 = vmatpush3.bf16.msra.mxu0 %v4041_v41  ;;  %v4085_v41 = vld [vmem:[%s5132_s6 + $0xc4] ss:$16 sps:$4 sm:$0xff]  }
 0x4b1   : > { %3793 = vmatprep.subr.bf16.mxu0 %v4382_v0 }
 0x4b2   : > { %v1162_v9 = vsel %vm823_vm8, %v1161_v8, -inf }
 0x538   : > { %v1052_v51 = vpop.xlane.xlu1 %1051 }
 0x539   : > { %v1053_v52 = vsub.f32 %v1049_v42, %v1052_v51  ;;  %v4042_v42 = vld [vmem:[#allocation4 + $0x18] sm:$0xff]  }
 0x53a   : > { %3794 = vmatpush3.bf16.msra.mxu0 %v4042_v42  ;;  %v4088_v42 = vld [vmem:[%s5132_s6 + $0xcc] ss:$16 sps:$4 sm:$0xff]  }
 0x53b   : > { %v1054_v53 = vmul.f32 1.442695, %v1053_v52  ;;  %3795 = vmatprep.subr.bf16.mxu0 %v4382_v0 }
 0x53d   : > { %4221 = vpow2.f32 %v1054_v53  ;;  %v4046_v53 = vld [vmem:[#allocation4 + $0x38] sm:$0xff]  }
 0x53e   : > { %3796 = vmatpush3.bf16.msra.mxu0 %v4043_v43  ;;  %v4083_v43 = vld [vmem:[%s5132_s6 + $0xc0] ss:$16 sps:$4 sm:$0xff]  }
 0x53f   : > { %3797 = vmatprep.subr.bf16.mxu0 %v4382_v0 }
 0x542   : > { %v4690_v54 = vpop.f32.mrb[8].mxu1  ;;  %3798 = vmatpush3.bf16.msra.mxu0 %v4044_v44  ;;  %v4086_v44 = vld [vmem:[%s5132_s6 + $0xc8] ss:$16 sps:$4 sm:$0xff]  }
 0x543   : > { %v3749_v55 = vpop.f32.mrb[9].mxu1  ;;  %3799 = vmatprep.subr.bf16.mxu0 %v4382_v0 }
 0x544   : > { %v880_v56 = vpop.f32.mrb[10].mxu1 }
 0x545   : > { %v3750_v57 = vpop.f32.mrb[11].mxu1 }
 0x546   : > { %3800 = vmatpush3.bf16.msra.mxu0 %v4045_v45  ;;  %v4091_v45 = vld [vmem:[%s5132_s6 + $0xe4] ss:$16 sps:$4 sm:$0xff]  }
 0x547   : > { %v4222_v58 = vpop.eup %4221  ;;  %3801 = vmatprep.subr.bf16.mxu0 %v4382_v0 }
 0x548   : > { %v1056_v59 = vsel %vm823_vm8, %v4222_v58, 0.0 }
 0x549   : > { %1057 = vadd.xlane.f32.xlu1 %v1056_v59 }
 0x54a   : > { %v929_v60 = vpop.f32.mrb[12].mxu1  ;;  %3802 = vmatpush3.bf16.msra.mxu0 %v4046_v53 }
 0x54b   : > { %v935_v62 = vmul.f32 0.17677669, %v929_v60  ;;  %v3755_v1 = vpop.f32.mrb[13].mxu1 }
 0x54c   : > { %v932_v2 = vpop.f32.mrb[14].mxu1 }
 0x54d   : > { %v3756_v3 = vpop.f32.mrb[15].mxu1  ;;  %v936_v4 = vadd.f32 %v935_v62, %v4659_v10 }
 0x54f   : > { %v937_v7 = vsel %vm823_vm8, %v936_v4, -inf }
 0x550   : > { %938 = vmax.xlane.f32.xlu0 %v937_v7 }
 0x554   : > { %1163 = vmax.xlane.f32.xlu0 %v1162_v9 }
 0x55a   : > { %950 = vrot.lane.b32.xlu1 %v4637_v63, %s4388_s26 }
 0x55e   : > { %1174 = vrot.lane.b32.xlu1 %v4637_v63, %s5143_s25 }
 0x5d6   : > { %v1058_v11 = vpop.xlane.xlu1 %1057 }
 0x5da   : > { %v951_v12 = vpop.permute.xlu1 %950 }
 0x5db   : > { %v956_v13 = vsel %vm839_vm3, %v951_v12, 0  ;;  %v4049_v12 = vld [vmem:[%s5132_s6 + $0x4] ss:$16 sps:$4 sm:$0xff]  }
 0x5dc   : > { %3758 = vmatpush3.bf16.msra.mxu1 %v956_v13  ;;  %v4052_v13 = vld [vmem:[%s5132_s6 + $0xc] ss:$16 sps:$4 sm:$0xff]  }
 0x5dd   : > { %v939_v14 = vpop.xlane.xlu0 %938  ;;  %3769 = vmatprep.subr.bf16.mxu1 %v4382_v0  ;;  %1594 = vmatprep.subr.bf16.mxu0 %v4052_v13  ;;  %v4107_v13 = vld [vmem:[#allocation6 + $0x70] sm:$0xff]  }
 0x5de   : > { %v940_v15 = vsub.f32 %v936_v4, %v939_v14  ;;  %v4055_v14 = vld [vmem:[%s5132_s6 + $0x24] ss:$16 sps:$4 sm:$0xff]  }
 0x5e0   : > { %v941_v16 = vmul.f32 1.442695, %v940_v15  ;;  %v4058_v15 = vld [vmem:[%s5132_s6 + $0x2c] ss:$16 sps:$4 sm:$0xff]  }
 0x5e1   : > { %v1164_v17 = vpop.xlane.xlu0 %1163 }
 0x5e2   : > { %4223 = vpow2.f32 %v941_v16  ;;  %v1165_v18 = vsub.f32 %v1161_v8, %v1164_v17  ;;  %v4053_v16 = vld [vmem:[%s5132_s6 + $0x20] ss:$16 sps:$4 sm:$0xff]   ;;  %v4056_v17 = vld [vmem:[%s5132_s6 + $0x28] ss:$16 sps:$4 sm:$0xff]  }
 0x5e4   : > { %v1166_v19 = vmul.f32 1.442695, %v1165_v18  ;;  %v4061_v18 = vld [vmem:[%s5132_s6 + $0x44] ss:$16 sps:$4 sm:$0xff]  }
 0x5e6   : > { %4225 = vpow2.f32 %v1166_v19  ;;  %v4064_v19 = vld [vmem:[%s5132_s6 + $0x4c] ss:$16 sps:$4 sm:$0xff]  }
 0x5ec   : > { %v4224_v20 = vpop.eup %4223 }
 0x5ed   : > { %v943_v21 = vsel %vm823_vm8, %v4224_v20, 0.0 }
 0x5ee   : > { %944 = vadd.xlane.f32.xlu0 %v943_v21  ;;  %v4062_v21 = vld [vmem:[%s5132_s6 + $0x48] ss:$16 sps:$4 sm:$0xff]  }
 0x5f0   : > { %v4226_v22 = vpop.eup %4225 }
 0x5f1   : > { %v1168_v23 = vsel %vm823_vm8, %v4226_v22, 0.0 }
 0x5f2   : > { %1169 = vadd.xlane.f32.xlu0 %v1168_v23  ;;  %v4273_v23 = vld [vmem:[%s4582_s18] sm:$0xff] }
 0x608   : > { %1062 = vrot.lane.b32.xlu0 %v4637_v63, %s4389_s13  ;;  %v1175_v63 = vpop.permute.xlu1 %1174 }
 0x609   : > { %v1180_v36 = vsel %vm839_vm3, %v1175_v63, 0  ;;  %v4071_v63 = vld [vmem:[%s5132_s6 + $0x80] ss:$16 sps:$4 sm:$0xff]  }
 0x67b   : > { %v945_v25 = vpop.xlane.xlu0 %944 }
 0x67c   : > { %4227 = vrcp.f32 %v945_v25 }
 0x67d   : > { %4229 = vrcp.f32 %v1058_v11  ;;  %v4047_v11 = vld [vmem:[%s5132_s6] ss:$16 sps:$4 sm:$0xff]  }
 0x67f   : > { %v1170_v26 = vpop.xlane.xlu0 %1169 }
 0x680   : > { %4231 = vrcp.f32 %v1170_v26 }
 0x683   : > { %v1063_v29 = vpop.permute.xlu0 %1062 }
 0x684   : > { %v1068_v32 = vsel %vm839_vm3, %v1063_v29, 0 }
 0x686   : > { %v4228_v27 = vpop.eup %4227 }
 0x687   : > { %v947_v28 = vmul.f32 %v4228_v27, %v4224_v20  ;;  %v4230_v31 = vpop.eup %4229  ;;  %v4059_v20 = vld [vmem:[%s5132_s6 + $0x40] ss:$16 sps:$4 sm:$0xff]  }
 0x688   : > { %v1060_v33 = vmul.f32 %v4230_v31, %v4222_v58  ;;  %v4070_v31 = vld [vmem:[%s5132_s6 + $0x6c] ss:$16 sps:$4 sm:$0xff]  }
 0x689   : > { %v948_v30 = vpack.c.bf16 %v947_v28, %v947_v28 }
 0x68a   : > { %v1061_v34 = vpack.c.bf16 %v1060_v33, %v1060_v33  ;;  %v4232_v35 = vpop.eup %4231  ;;  %v4068_v33 = vld [vmem:[%s5132_s6 + $0x68] ss:$16 sps:$4 sm:$0xff]  }
 0x68b   : > { %3760 = vmatmul.mubr.msk.bf16.vlgmr.msra.gmra.mrb[16].mxu1 %vm823_vm8, %v948_v30  ;;  %v1172_v37 = vmul.f32 %v4232_v35, %v4226_v22  ;;  %v4067_v30 = vld [vmem:[%s5132_s6 + $0x64] ss:$16 sps:$4 sm:$0xff]   ;;  %v4074_v35 = vld [vmem:[%s5132_s6 + $0x88] ss:$16 sps:$4 sm:$0xff]  }
 0x68c   : > { %3770 = vmatpush3.bf16.msra.mxu1 %v1068_v32  ;;  %3771 = vmatprep.mubr.msk.bf16.mxu1 %vm4384_vm0, %v4382_v0  ;;  %v4065_v32 = vld [vmem:[%s5132_s6 + $0x60] ss:$16 sps:$4 sm:$0xff]  }
 0x68d   : > { %3781 = vmatprep.subr.bf16.mxu1 %v4382_v0  ;;  %v1173_v38 = vpack.c.bf16 %v1172_v37, %v1172_v37  ;;  %v4079_v37 = vld [vmem:[%s5132_s6 + $0xa4] ss:$16 sps:$4 sm:$0xff]  }
 0x693   : > { %3772 = vmatmul.mubr.msk.bf16.vlgmr.msra.gmra.mrb[20].mxu1 %vm823_vm8, %v1061_v34  ;;  %v4073_v34 = vld [vmem:[%s5132_s6 + $0x84] ss:$16 sps:$4 sm:$0xff]  }
 0x694   : > { %3782 = vmatpush3.bf16.msra.mxu1 %v1180_v36  ;;  %3783 = vmatprep.mubr.msk.bf16.mxu1 %vm4384_vm0, %v4382_v0  ;;  %v4076_v36 = vld [vmem:[%s5132_s6 + $0x8c] ss:$16 sps:$4 sm:$0xff]  }
 0x695   : > { %1553 = vmatprep.subr.bf16.mxu1 %v4049_v12  ;;  %v4105_v12 = vld [vmem:[#allocation6 + $0x68] sm:$0xff]  }
 0x69b   : > { %3784 = vmatmul.mubr.msk.bf16.vlgmr.msra.gmra.mrb[24].mxu1 %vm823_vm8, %v1173_v38  ;;  %v4082_v38 = vld [vmem:[%s5132_s6 + $0xac] ss:$16 sps:$4 sm:$0xff]  }
 0x69c   : > { %1585 = vmatprep.mubr.bf16.mxu1 %v4383_v24  ;;  %1554 = vmatpush1.bf16.msra.mxu1 %v4047_v11  ;;  %v4104_v11 = vld [vmem:[#allocation6 + $0x20] sm:$0xff]  }
 0x69d   : > { %1555 = vmatprep.subr.bf16.mxu1 %v4055_v14  ;;  %v4108_v14 = vld [vmem:[#allocation6 + $0x30] sm:$0xff]  }
 0x6a0   : > { %1556 = vmatpush1.bf16.msra.mxu1 %v4053_v16  ;;  %v4110_v16 = vld [vmem:[#allocation6 + $0x38] sm:$0xff]  }
 0x6a1   : > { %1557 = vmatprep.subr.bf16.mxu1 %v4061_v18 }
 0x6a4   : > { %1558 = vmatpush1.bf16.msra.mxu1 %v4059_v20 }
 0x6a5   : > { %1559 = vmatprep.subr.bf16.mxu1 %v4067_v30 }
 0x6a8   : > { %1560 = vmatpush1.bf16.msra.mxu1 %v4065_v32 }
 0x6a9   : > { %1561 = vmatprep.subr.bf16.mxu1 %v4073_v34 }
 0x6ac   : > { %1562 = vmatpush1.bf16.msra.mxu1 %v4071_v63 }
 0x6ad   : > { %1563 = vmatprep.subr.bf16.mxu1 %v4079_v37 }
 0x6b0   : > { %1564 = vmatpush1.bf16.msra.mxu1 %v4077_v39 }
 0x6b1   : > { %1565 = vmatprep.subr.bf16.mxu1 %v4085_v41  ;;  %v4113_v41 = vld [vmem:[#allocation2 + $0xc4] ss:$12 sps:$4 sm:$0xff]  }
 0x6b4   : > { %1566 = vmatpush1.bf16.msra.mxu1 %v4083_v43  ;;  %v4117_v43 = vld [vmem:[#allocation2 + $0xdc] ss:$12 sps:$4 sm:$0xff]  }
 0x6b5   : > { %1567 = vmatprep.subr.bf16.mxu1 %v4091_v45  ;;  %v4115_v45 = vld [vmem:[#allocation2 + $0xd8] ss:$12 sps:$4 sm:$0xff]  }
 0x75e   : > { %v992_v46 = vpop.f32.mrb[16].mxu1 }
 0x75f   : > { %1223 = vrot.lane.b32.xlu1 %v992_v46, %s5143_s25  ;;  %v3761_v50 = vpop.f32.mrb[17].mxu1  ;;  %v4094_v46 = vld [vmem:[%s5132_s6 + $0xec] ss:$16 sps:$4 sm:$0xff]  }
 0x760   : > { %v995_v51 = vpop.f32.mrb[18].mxu1  ;;  %v4089_v50 = vld [vmem:[%s5132_s6 + $0xe0] ss:$16 sps:$4 sm:$0xff]  }
 0x761   : > { %v3762_v52 = vpop.f32.mrb[19].mxu1  ;;  %v4092_v51 = vld [vmem:[%s5132_s6 + $0xe8] ss:$16 sps:$4 sm:$0xff]   ;;  %1568 = vmatpush1.bf16.msra.mxu1 %v4089_v50 }
 0x762   : > { %v4122_v50 = vld [vmem:[#allocation2 + $0xf8] ss:$12 sps:$4 sm:$0xff]  }
 0x766   : > { %v1104_v55 = vpop.f32.mrb[20].mxu1 }
 0x767   : > { %1227 = vrot.lane.b32.xlu0 %v1104_v55, %s4389_s13  ;;  %v3773_v56 = vpop.f32.mrb[21].mxu1 }
 0x768   : > { %v1107_v57 = vpop.f32.mrb[22].mxu1 }
 0x769   : > { %v3774_v58 = vpop.f32.mrb[23].mxu1  ;;  %v3409_v57 = vld [vmem:[%s5131_s5] ss:$0 sm:$0xff] }
 0x76e   : > { %v1216_v59 = vpop.f32.mrb[24].mxu1 }
 0x76f   : > { %1231 = vrot.lane.b32.xlu1 %v1216_v59, %s4388_s26  ;;  %v3785_v60 = vpop.f32.mrb[25].mxu1 }
 0x770   : > { %v1219_v61 = vpop.f32.mrb[26].mxu1 }
 0x771   : > { %v3786_v62 = vpop.f32.mrb[27].mxu1  ;;  %v4095_v61 = vld [vmem:[#allocation6 + $0x40] sm:$0xff]  }
 0x772   : > { %v4096_v62 = vld [vmem:[#allocation6] sm:$0xff]   ;;  %3624 = vmatprep.subr.bf16.mxu1 %v4095_v61  ;;  %v4123_v61 = vld [vmem:[#allocation2 + $0x108] ss:$12 sps:$4 sm:$0xff]  }
 0x7d1   : > { %v1224_v1 = vpop.permute.xlu1 %1223 }
 0x7d2   : > { %v1234_v3 = vsel %vm774_vm2, %v4690_v54, %v1224_v1  ;;  %v4050_v54 = vld [vmem:[%s5132_s6 + $0x8] ss:$16 sps:$4 sm:$0xff]  }
 0x7d3   : > { %v4097_v1 = vld [vmem:[#allocation6 + $0x48] sm:$0xff]  }
 0x7d9   : > { %v1228_v2 = vpop.permute.xlu0 %1227 }
 0x7da   : > { %v1236_v4 = vsel %vm1235_vm9, %v1234_v3, %v1228_v2  ;;  %v4098_v2 = vld [vmem:[#allocation6 + $0x8] sm:$0xff]   ;;  %v4099_v3 = vld [vmem:[#allocation6 + $0x50] sm:$0xff]  }
 0x7e1   : > { %v1232_v7 = vpop.permute.xlu1 %1231 }
 0x7e2   : > { %v1238_v8 = vsel %vm1237_vm10, %v1236_v4, %v1232_v7  ;;  %v4100_v4 = vld [vmem:[#allocation6 + $0x10] sm:$0xff]   ;;  %v4101_v7 = vld [vmem:[#allocation6 + $0x58] sm:$0xff]  }
 0x7e3   : > { %v1239_v9 = vpack.c.bf16 %v1238_v8, %v1238_v8  ;;  %v4102_v8 = vld [vmem:[#allocation6 + $0x18] sm:$0xff]  }
 0x7e5   : > { %3804 = vmatmul.mubr.bf16.vlgmr.msra.gmra.mrb[12].mxu0 %v1239_v9  ;;  %v4103_v9 = vld [vmem:[#allocation6 + $0x60] sm:$0xff]  }
 0x7e6   : > { %1626 = vmatprep.mubr.bf16.mxu0 %v4383_v24  ;;  %1595 = vmatpush1.bf16.msra.mxu0 %v4050_v54  ;;  %v4106_v54 = vld [vmem:[#allocation6 + $0x28] sm:$0xff]  }
 0x7e7   : > { %1596 = vmatprep.subr.bf16.mxu0 %v4058_v15  ;;  %v4109_v15 = vld [vmem:[#allocation6 + $0x78] sm:$0xff]  }
 0x7ea   : > { %1597 = vmatpush1.bf16.msra.mxu0 %v4056_v17 }
 0x7eb   : > { %1598 = vmatprep.subr.bf16.mxu0 %v4064_v19 }
 0x7ee   : > { %1599 = vmatpush1.bf16.msra.mxu0 %v4062_v21 }
 0x7ef   : > { %1600 = vmatprep.subr.bf16.mxu0 %v4070_v31 }
 0x7f2   : > { %1601 = vmatpush1.bf16.msra.mxu0 %v4068_v33 }
 0x7f3   : > { %1602 = vmatprep.subr.bf16.mxu0 %v4076_v36 }
 0x7f6   : > { %1603 = vmatpush1.bf16.msra.mxu0 %v4074_v35 }
 0x7f7   : > { %1604 = vmatprep.subr.bf16.mxu0 %v4082_v38 }
 0x7fa   : > { %1605 = vmatpush1.bf16.msra.mxu0 %v4080_v40  ;;  %v4111_v40 = vld [vmem:[#allocation2 + $0xc0] ss:$12 sps:$4 sm:$0xff]  }
 0x7fb   : > { %1606 = vmatprep.subr.bf16.mxu0 %v4088_v42  ;;  %v4114_v42 = vld [vmem:[#allocation2 + $0xc8] ss:$12 sps:$4 sm:$0xff]  }
 0x7fe   : > { %1607 = vmatpush1.bf16.msra.mxu0 %v4086_v44  ;;  %v4118_v44 = vld [vmem:[#allocation2 + $0xe0] ss:$12 sps:$4 sm:$0xff]  }
 0x7ff   : > { %1608 = vmatprep.subr.bf16.mxu0 %v4094_v46  ;;  %v4121_v46 = vld [vmem:[#allocation2 + $0xf4] ss:$12 sps:$4 sm:$0xff]  }
 0x802   : > { %1609 = vmatpush1.bf16.msra.mxu0 %v4092_v51  ;;  %v4119_v51 = vld [vmem:[#allocation2 + $0xf0] ss:$12 sps:$4 sm:$0xff]  }
 0x803   : > { %2000 = vmatprep.subr.bf16.mxu0 %v4113_v41 }
 0x8b8   : > { %v1338_v22 = vpop.f32.mrb[12].mxu0 }
 0x8b9   : > { %v4770_v25 = vadd.f32 %v4273_v23, %v1338_v22  ;;  %v3805_v26 = vpop.f32.mrb[13].mxu0 }
 0x8ba   : > { %v1341_v27 = vpop.f32.mrb[14].mxu0 }
 0x8bb   : > { %v3806_v28 = vpop.f32.mrb[15].mxu0  ;;  %v1346_v29 = vmul.f32 %v4770_v25, %v4770_v25 }
 0x8bd   : > { %1347 = vadd.xlane.f32.xlu0 %v1346_v29 }
 0x94a   : > { %v1348_v52 = vpop.xlane.xlu0 %1347 }
 0x94b   : > { %v1349_v53 = vmul.f32 0.0078125, %v1348_v52 }
 0x94d   : > { %v1350_v55 = vadd.f32 1e-05, %v1349_v53 }
 0x94f   : > { %4233 = vrsqrt.f32 %v1350_v55 }
 0x959   : > { %v4234_v56 = vpop.eup %4233 }
 0x95a   : > { %v1352_v58 = vmul.f32 %v4234_v56, %v4770_v25 }
 0x95c   : > { %v1359_v59 = vmul.f32 %v3409_v57, %v1352_v58 }
 0x95e   : > { %v1360_v60 = vpack.c.bf16 %v1359_v59, %v1359_v59 }
 0x960   : > { %1586 = vmatmul.mubr.bf16.vlgmr.msra.gmra.mrb[28].mxu1 %v1360_v60  ;;  %1627 = vmatmul.mubr.bf16.vlgmr.msra.gmra.mrb[16].mxu0 %v1360_v60  ;;  %v4125_v60 = vld [vmem:[#allocation2 + $0x10c] ss:$12 sps:$4 sm:$0xff]  }
 0x961   : > { %2032 = vmatprep.mubr.bf16.mxu0 %v4383_v24  ;;  %3625 = vmatpush3.bf16.msra.mxu1 %v4096_v62  ;;  %v4126_v62 = vld [vmem:[#allocation2 + $0x110] ss:$12 sps:$4 sm:$0xff]  }
 0x962   : > { %3626 = vmatprep.subr.bf16.mxu1 %v4097_v1  ;;  %2001 = vmatpush1.bf16.msra.mxu0 %v4111_v40  ;;  %v4127_v1 = vld [vmem:[#allocation2 + $0x120] ss:$12 sps:$4 sm:$0xff]  }
 0x963   : > { %2002 = vmatprep.subr.bf16.mxu0 %v4117_v43 }
 0x965   : > { %3627 = vmatpush3.bf16.msra.mxu1 %v4098_v2  ;;  %v4129_v2 = vld [vmem:[#allocation2 + $0x124] ss:$12 sps:$4 sm:$0xff]  }
 0x966   : > { %3628 = vmatprep.subr.bf16.mxu1 %v4099_v3  ;;  %2003 = vmatpush1.bf16.msra.mxu0 %v4115_v45  ;;  %v4130_v3 = vld [vmem:[#allocation2 + $0x128] ss:$12 sps:$4 sm:$0xff]  }
 0x967   : > { %2004 = vmatprep.subr.bf16.mxu0 %v4121_v46 }
 0x969   : > { %3629 = vmatpush3.bf16.msra.mxu1 %v4100_v4  ;;  %v4133_v4 = vld [vmem:[#allocation2 + $0x13c] ss:$12 sps:$4 sm:$0xff]  }
 0x96a   : > { %3630 = vmatprep.subr.bf16.mxu1 %v4101_v7  ;;  %2005 = vmatpush1.bf16.msra.mxu0 %v4119_v51  ;;  %v4134_v7 = vld [vmem:[#allocation2 + $0x140] ss:$12 sps:$4 sm:$0xff]  }
 0x96b   : > { %2006 = vmatprep.subr.bf16.mxu0 %v4125_v60 }
 0x96d   : > { %3631 = vmatpush3.bf16.msra.mxu1 %v4102_v8  ;;  %v4137_v8 = vld [vmem:[#allocation2 + $0x154] ss:$12 sps:$4 sm:$0xff]  }
 0x96e   : > { %3632 = vmatprep.subr.bf16.mxu1 %v4103_v9  ;;  %2007 = vmatpush1.bf16.msra.mxu0 %v4123_v61  ;;  %v4135_v9 = vld [vmem:[#allocation2 + $0x150] ss:$12 sps:$4 sm:$0xff]  }
 0x96f   : > { %2008 = vmatprep.subr.bf16.mxu0 %v4129_v2 }
 0x971   : > { %3633 = vmatpush3.bf16.msra.mxu1 %v4104_v11  ;;  %v4138_v11 = vld [vmem:[#allocation2 + $0x158] ss:$12 sps:$4 sm:$0xff]  }
 0x972   : > { %3634 = vmatprep.subr.bf16.mxu1 %v4105_v12  ;;  %2009 = vmatpush1.bf16.msra.mxu0 %v4127_v1  ;;  %v4141_v12 = vld [vmem:[#allocation2 + $0x16c] ss:$12 sps:$4 sm:$0xff]  }
 0x973   : > { %2010 = vmatprep.subr.bf16.mxu0 %v4133_v4 }
 0x975   : > { %3635 = vmatpush3.bf16.msra.mxu1 %v4106_v54  ;;  %v4139_v54 = vld [vmem:[#allocation2 + $0x168] ss:$12 sps:$4 sm:$0xff]  }
 0x976   : > { %3636 = vmatprep.subr.bf16.mxu1 %v4107_v13  ;;  %v4142_v13 = vld [vmem:[#allocation2 + $0x170] ss:$12 sps:$4 sm:$0xff]  }
 0x979   : > { %3637 = vmatpush3.bf16.msra.mxu1 %v4108_v14 }
 0x97a   : > { %3638 = vmatprep.subr.bf16.mxu1 %v4109_v15 }
 0x97d   : > { %3639 = vmatpush3.bf16.msra.mxu1 %v4110_v16 }
 0x97e   : > { %3807 = vmatprep.subr.bf16.mxu1 %v4382_v0 }
 0xa33   : > { %v1587_v17 = vpop.f32.mrb[28].mxu1  ;;  %v1628_v18 = vpop.f32.mrb[16].mxu0 }
 0xa34   : > { %v3442_v19 = vmul.f32 -1.442695, %v1587_v17  ;;  %v1589_v20 = vpop.f32.mrb[29].mxu1  ;;  %v1630_v21 = vpop.f32.mrb[17].mxu0 }
 0xa35   : > { %v3443_v22 = vmul.f32 -1.442695, %v1589_v20  ;;  %v1591_v23 = vpop.f32.mrb[30].mxu1  ;;  %v1632_v26 = vpop.f32.mrb[18].mxu0 }
 0xa36   : > { %4235 = vpow2.f32 %v3442_v19  ;;  %v1592_v27 = vpop.f32.mrb[31].mxu1  ;;  %v1633_v28 = vpop.f32.mrb[19].mxu0 }
 0xa37   : > { %4237 = vpow2.f32 %v3443_v22 }
 0xa40   : > { %v4236_v29 = vpop.eup %4235 }
 0xa41   : > { %v4238_v30 = vpop.eup %4237  ;;  %v1641_v31 = vadd.f32 1.0, %v4236_v29 }
 0xa42   : > { %v1642_v32 = vadd.f32 1.0, %v4238_v30 }
 0xa43   : > { %4239 = vrcp.f32 %v1641_v31 }
 0xa44   : > { %4241 = vrcp.f32 %v1642_v32 }
 0xa4d   : > { %v4240_v33 = vpop.eup %4239 }
 0xa4e   : > { %v4242_v63 = vpop.eup %4241  ;;  %v1647_v34 = vmul.f32 %v4240_v33, %v1587_v17 }
 0xa4f   : > { %v1648_v35 = vmul.f32 %v4242_v63, %v1589_v20 }
 0xa50   : > { %v1649_v36 = vmul.f32 %v1647_v34, %v1628_v18  ;;  %v3461_v18 = vld [vmem:[%s5128_s2 + $0x1] ss:$0 sm:$0xff] }
 0xa51   : > { %v1650_v37 = vmul.f32 %v1648_v35, %v1630_v21 }
 0xa52   : > { %v1651_v39 = vpack.c.bf16 %v1649_v36, %v1649_v36 }
 0xa53   : > { %v1652_v38 = vpack.c.bf16 %v1650_v37, %v1650_v37 }
 0xa55   : > { %1813 = vmatprep.mubr.bf16.mxu1 %v1652_v38 }
 0xa56   : > { %1814 = vmatmul.mubr.bf16.vlgmr.msra.gmra.mrb[32].mxu1 %v1651_v39 }
 0xa57   : > { %3823 = vmatprep.mubr.msk.bf16.mxu1 %vm4384_vm0, %v4382_v0  ;;  %3808 = vmatpush3.bf16.msra.mxu1 %v4114_v42 }
 0xa58   : > { %3809 = vmatprep.subr.bf16.mxu1 %v4382_v0 }
 0xa5b   : > { %3810 = vmatpush3.bf16.msra.mxu1 %v4118_v44 }
 0xa5c   : > { %3811 = vmatprep.subr.bf16.mxu1 %v4382_v0 }
 0xa5f   : > { %3812 = vmatpush3.bf16.msra.mxu1 %v4122_v50 }
 0xa60   : > { %3813 = vmatprep.subr.bf16.mxu1 %v4382_v0 }
 0xa63   : > { %3814 = vmatpush3.bf16.msra.mxu1 %v4126_v62 }
 0xa64   : > { %3815 = vmatprep.subr.bf16.mxu1 %v4382_v0 }
 0xa67   : > { %3816 = vmatpush3.bf16.msra.mxu1 %v4130_v3 }
 0xa68   : > { %3817 = vmatprep.subr.bf16.mxu1 %v4382_v0 }
 0xa6b   : > { %3818 = vmatpush3.bf16.msra.mxu1 %v4134_v7 }
 0xa6c   : > { %3819 = vmatprep.subr.bf16.mxu1 %v4382_v0 }
 0xa6f   : > { %3820 = vmatpush3.bf16.msra.mxu1 %v4138_v11 }
 0xa70   : > { %3821 = vmatprep.subr.bf16.mxu1 %v4382_v0 }
 0xa73   : > { %3822 = vmatpush3.bf16.msra.mxu1 %v4142_v13 }
 0xa74   : > { %3833 = vmatprep.subr.bf16.mxu1 %v4382_v0 }
 0xb29   : > { %v3640_v52 = vpop.f32.mrb[32].mxu1 }
 0xb2a   : > { %v3641_v53 = vpop.f32.mrb[33].mxu1 }
 0xb2b   : > { %v3642_v55 = vadd.f32 %v3641_v53, %v3640_v52  ;;  %v3643_v56 = vpop.f32.mrb[34].mxu1 }
 0xb2c   : > { %v3644_v57 = vpop.f32.mrb[35].mxu1 }
 0xb2d   : > { %v4846_v58 = vadd.f32 %v3642_v55, %v4770_v25  ;;  %v4131_v25 = vld [vmem:[#allocation2 + $0x138] ss:$12 sps:$4 sm:$0xff]  }
 0xb2e   : > { %2011 = vmatpush1.bf16.msra.mxu0 %v4131_v25 }
 0xb2f   : > { %v1824_v59 = vmul.f32 %v4846_v58, %v4846_v58  ;;  %2012 = vmatprep.subr.bf16.mxu0 %v4137_v8 }
 0xb31   : > { %1825 = vadd.xlane.f32.xlu1 %v1824_v59 }
 0xb32   : > { %2013 = vmatpush1.bf16.msra.mxu0 %v4135_v9 }
 0xb33   : > { %2014 = vmatprep.subr.bf16.mxu0 %v4141_v12 }
 0xb36   : > { %2015 = vmatpush1.bf16.msra.mxu0 %v4139_v54 }
 0xb37   : > { %3827 = vmatprep.subr.bf16.mxu0 %v4382_v0 }
 0xbbe   : > { %v1826_v14 = vpop.xlane.xlu1 %1825 }
 0xbbf   : > { %v1827_v15 = vmul.f32 0.0078125, %v1826_v14 }
 0xbc1   : > { %v1828_v16 = vadd.f32 1e-05, %v1827_v15 }
 0xbc3   : > { %4243 = vrsqrt.f32 %v1828_v16 }
 0xbcd   : > { %v4244_v17 = vpop.eup %4243 }
 0xbce   : > { %v1830_v19 = vmul.f32 %v4244_v17, %v4846_v58 }
 0xbd0   : > { %v1837_v20 = vmul.f32 %v3461_v18, %v1830_v19 }
 0xbd2   : > { %v1838_v21 = vpack.c.bf16 %v1837_v20, %v1837_v20 }
 0xbd4   : > { %2033 = vmatmul.mubr.bf16.vlgmr.msra.gmra.mrb[20].mxu0 %v1838_v21  ;;  %3824 = vmatmul.mubr.bf16.vlgmr.msra.gmra.mrb[36].mxu1 %v1838_v21 }
 0xbd5   : > { %3829 = vmatprep.mubr.msk.bf16.mxu0 %vm4384_vm0, %v4382_v0  ;;  %3835 = vmatprep.mubr.msk.bf16.mxu1 %vm4384_vm0, %v4382_v0 }
 0xca7   : > { %v2034_v22 = vpop.f32.mrb[20].mxu0  ;;  %v2075_v23 = vpop.f32.mrb[36].mxu1 }
 0xca8   : > { %v4864_v26 = vpack.c.bf16 %v2075_v23, %v2075_v23  ;;  %v2036_v27 = vpop.f32.mrb[21].mxu0  ;;  %v3825_v28 = vpop.f32.mrb[37].mxu1  ;;  %v2086_v42 = vmul.f32 %v2034_v22, %v4620_v48 }
 0xca9   : > { %v2078_v29 = vpop.f32.mrb[38].mxu1  ;;  %2091 = vrot.lane.b32.xlu1 %v2036_v27, %s4385_s15  ;;  %2089 = vrot.lane.b32.xlu0 %v2036_v27, %s4386_s16  ;;  %v2038_v30 = vpop.f32.mrb[22].mxu0  ;;  %v2094_v36 = vmul.f32 %v2036_v27, %v4620_v48 }
 0xcaa   : > { %v2039_v31 = vpop.f32.mrb[23].mxu0  ;;  %v3826_v32 = vpop.f32.mrb[39].mxu1  ;;  %v2164_v33 = vsel %vm839_vm3, %v4864_v26, 0 }
 0xcab   : > { %3834 = vmatpush3.bf16.msra.mxu1 %v2164_v33 }
 0xcac   : > { %3845 = vmatprep.subr.bf16.mxu1 %v4382_v0 }
 0xcad   : > { %2083 = vrot.lane.b32.xlu1 %v2034_v22, %s4385_s15  ;;  %2081 = vrot.lane.b32.xlu0 %v2034_v22, %s4386_s16  ;;  %s5157_s15 = smov 32  }
 0xd1b   : > { %v2092_v63 = vpop.permute.xlu1 %2091  ;;  %v2090_v34 = vpop.permute.xlu0 %2089 }
 0xd1c   : > { %v2093_v35 = vsel %vm4613_vm1, %v2090_v34, %v2092_v63 }
 0xd1d   : > { %v2095_v37 = vmul.f32 %v2093_v35, %v4625_v49 }
 0xd1f   : > { %v2096_v38 = vadd.f32 %v2095_v37, %v2094_v36  ;;  %v2084_v39 = vpop.permute.xlu1 %2083  ;;  %v2082_v40 = vpop.permute.xlu0 %2081 }
 0xd20   : > { %v2085_v41 = vsel %vm4613_vm1, %v2082_v40, %v2084_v39 }
 0xd21   : > { %v2098_v43 = vpack.c.bf16 %v2096_v38, %v2096_v38  ;;  %v2087_v44 = vmul.f32 %v2085_v41, %v4625_v49 }
 0xd23   : > { %v2088_v45 = vadd.f32 %v2087_v44, %v2086_v42  ;;  %2210 = vrot.lane.b32.xlu0 %v2098_v43, %s4388_s26  ;;  %v2104_v46 = vsel %vm774_vm2, %v2098_v43, 0 }
 0xd24   : > { %3828 = vmatpush3.bf16.xpose.msra.mxu0 %v2104_v46 }
 0xd25   : > { %v2097_v50 = vpack.c.bf16 %v2088_v45, %v2088_v45  ;;  %3839 = vmatprep.subr.bf16.mxu0 %v4382_v0 }
 0xd27   : > { %2207 = vrot.lane.b32.xlu1 %v2097_v50, %s4388_s26  ;;  %2323 = vrot.lane.b32.xlu0 %v2098_v43, %s4389_s13 }
 0xd2b   : > { %2321 = vrot.lane.b32.xlu1 %v2097_v50, %s4389_s13  ;;  %2435 = vrot.lane.b32.xlu0 %v2098_v43, %s5157_s15 }
 0xd2c   : > { %3830 = vmatmul.mubr.msk.bf16.vlgmr.msra.gmra.mrb[24].mxu0 %vm774_vm2, %v2097_v50 }
 0xd2d   : > { %3841 = vmatprep.mubr.msk.bf16.mxu0 %vm4384_vm0, %v4382_v0 }
 0xd2f   : > { %2433 = vrot.lane.b32.xlu1 %v2097_v50, %s5157_s15 }
 0xd95   : > { %v2211_v47 = vpop.permute.xlu0 %2210 }
 0xd96   : > { %v2216_v48 = vsel %vm774_vm2, %v2211_v47, 0 }
 0xd97   : > { %3840 = vmatpush3.bf16.xpose.msra.mxu0 %v2216_v48 }
 0xd98   : > { %3851 = vmatprep.subr.bf16.mxu0 %v4382_v0 }
 0xd99   : > { %v2324_v49 = vpop.permute.xlu0 %2323  ;;  %v2208_v51 = vpop.permute.xlu1 %2207 }
 0xd9a   : > { %v2329_v52 = vsel %vm774_vm2, %v2324_v49, 0 }
 0xd9d   : > { %v2436_v53 = vpop.permute.xlu0 %2435  ;;  %v2322_v55 = vpop.permute.xlu1 %2321 }
 0xd9e   : > { %3842 = vmatmul.mubr.msk.bf16.vlgmr.msra.gmra.mrb[28].mxu0 %vm774_vm2, %v2208_v51  ;;  %v2441_v56 = vsel %vm774_vm2, %v2436_v53, 0 }
 0xd9f   : > { %3852 = vmatpush3.bf16.xpose.msra.mxu0 %v2329_v52  ;;  %3853 = vmatprep.mubr.msk.bf16.mxu0 %vm4384_vm0, %v4382_v0 }
 0xda0   : > { %3863 = vmatprep.subr.bf16.mxu0 %v4382_v0 }
 0xda1   : > { %v2434_v57 = vpop.permute.xlu1 %2433 }
 0xda6   : > { %3854 = vmatmul.mubr.msk.bf16.vlgmr.msra.gmra.mrb[32].mxu0 %vm774_vm2, %v2322_v55 }
 0xda7   : > { %3864 = vmatpush3.bf16.xpose.msra.mxu0 %v2441_v56  ;;  %3865 = vmatprep.mubr.msk.bf16.mxu0 %vm4384_vm0, %v4382_v0 }
 0xda8   : > { %3875 = vmatprep.subr.bf16.mxu0 %v4382_v0 }
 0xdae   : > { %3866 = vmatmul.mubr.msk.bf16.vlgmr.msra.gmra.mrb[36].mxu0 %vm774_vm2, %v2434_v57 }
 0xdaf   : > { %3891 = vmatprep.mubr.msk.bf16.mxu0 %vm4384_vm0, %v4382_v0 }
 0xdff   : > { %v2140_v59 = vpop.f32.mrb[24].mxu0 }
 0xe00   : > { %v2146_v60 = vmul.f32 0.17677669, %v2140_v59  ;;  %v3831_v61 = vpop.f32.mrb[25].mxu0 }
 0xe01   : > { %v2143_v62 = vpop.f32.mrb[26].mxu0 }
 0xe02   : > { %v3832_v1 = vpop.f32.mrb[27].mxu0  ;;  %v2147_v2 = vadd.f32 %v2146_v60, %v4659_v10 }
 0xe04   : > { %v2148_v3 = vsel %vm823_vm8, %v2147_v2, -inf }
 0xe05   : > { %2149 = vmax.xlane.f32.xlu0 %v2148_v3 }
 0xe71   : > { %v2252_v4 = vpop.f32.mrb[28].mxu0 }
 0xe72   : > { %v2258_v25 = vmul.f32 0.17677669, %v2252_v4  ;;  %v3843_v7 = vpop.f32.mrb[29].mxu0 }
 0xe73   : > { %v2255_v8 = vpop.f32.mrb[30].mxu0 }
 0xe74   : > { %v3844_v9 = vpop.f32.mrb[31].mxu0  ;;  %v2259_v11 = vadd.f32 %v2258_v25, %v4659_v10 }
 0xe76   : > { %v2260_v12 = vsel %vm823_vm8, %v2259_v11, -inf }
 0xe77   : > { %2261 = vmax.xlane.f32.xlu1 %v2260_v12 }
 0xe79   : > { %v2365_v54 = vpop.f32.mrb[32].mxu0 }
 0xe7a   : > { %v2371_v13 = vmul.f32 0.17677669, %v2365_v54  ;;  %v3855_v14 = vpop.f32.mrb[33].mxu0 }
 0xe7b   : > { %v2368_v15 = vpop.f32.mrb[34].mxu0  ;;  %v4144_v14 = vld [vmem:[#allocation4 + $0x48] sm:$0xff]  }
 0xe7c   : > { %v3856_v16 = vpop.f32.mrb[35].mxu0  ;;  %v2372_v17 = vadd.f32 %v2371_v13, %v4659_v10  ;;  %v4143_v13 = vld [vmem:[#allocation4 + $0x40] sm:$0xff]   ;;  %v4145_v15 = vld [vmem:[#allocation4 + $0x50] sm:$0xff]  }
 0xe7d   : > { %3876 = vmatpush3.bf16.msra.mxu0 %v4143_v13  ;;  %v4146_v16 = vld [vmem:[#allocation4 + $0x58] sm:$0xff]   ;;  %v4195_v13 = vld [vmem:[%s5132_s6 + $0x1e4] ss:$16 sps:$4 sm:$0xff]  }
 0xe7e   : > { %v2373_v18 = vsel %vm823_vm8, %v2372_v17, -inf  ;;  %3877 = vmatprep.subr.bf16.mxu0 %v4382_v0 }
 0xe7f   : > { %2374 = vmax.xlane.f32.xlu0 %v2373_v18  ;;  %v4148_v18 = vld [vmem:[#allocation4 + $0x68] sm:$0xff]  }
 0xe81   : > { %v2477_v19 = vpop.f32.mrb[36].mxu0  ;;  %3878 = vmatpush3.bf16.msra.mxu0 %v4144_v14  ;;  %v4198_v14 = vld [vmem:[%s5132_s6 + $0x1ec] ss:$16 sps:$4 sm:$0xff]  }
 0xe82   : > { %v2483_v20 = vmul.f32 0.17677669, %v2477_v19  ;;  %v3867_v21 = vpop.f32.mrb[37].mxu0  ;;  %3879 = vmatprep.subr.bf16.mxu0 %v4382_v0  ;;  %v4149_v19 = vld [vmem:[#allocation4 + $0x70] sm:$0xff]  }
 0xe83   : > { %v2480_v22 = vpop.f32.mrb[38].mxu0 }
 0xe84   : > { %v3868_v23 = vpop.f32.mrb[39].mxu0  ;;  %v2484_v27 = vadd.f32 %v2483_v20, %v4659_v10 }
 0xe85   : > { %3880 = vmatpush3.bf16.msra.mxu0 %v4145_v15  ;;  %v4193_v15 = vld [vmem:[%s5132_s6 + $0x1e0] ss:$16 sps:$4 sm:$0xff]  }
 0xe86   : > { %v2485_v28 = vsel %vm823_vm8, %v2484_v27, -inf  ;;  %3881 = vmatprep.subr.bf16.mxu0 %v4382_v0 }
 0xe87   : > { %2486 = vmax.xlane.f32.xlu0 %v2485_v28 }
 0xe89   : > { %3882 = vmatpush3.bf16.msra.mxu0 %v4146_v16  ;;  %v4196_v16 = vld [vmem:[%s5132_s6 + $0x1e8] ss:$16 sps:$4 sm:$0xff]  }
 0xe8a   : > { %3883 = vmatprep.subr.bf16.mxu0 %v4382_v0 }
 0xe92   : > { %v2150_v29 = vpop.xlane.xlu0 %2149 }
 0xe93   : > { %v2151_v30 = vsub.f32 %v2147_v2, %v2150_v29 }
 0xe95   : > { %v2152_v31 = vmul.f32 1.442695, %v2151_v30 }
 0xe97   : > { %4245 = vpow2.f32 %v2152_v31 }
 0xea1   : > { %v4246_v32 = vpop.eup %4245 }
 0xea2   : > { %v2154_v33 = vsel %vm823_vm8, %v4246_v32, 0.0 }
 0xea3   : > { %2155 = vadd.xlane.f32.xlu1 %v2154_v33 }
 0xeb4   : > { %2273 = vrot.lane.b32.xlu1 %v4864_v26, %s4388_s26 }
 0xf04   : > { %v2262_v63 = vpop.xlane.xlu1 %2261 }
 0xf05   : > { %v2263_v34 = vsub.f32 %v2259_v11, %v2262_v63 }
 0xf07   : > { %v2264_v35 = vmul.f32 1.442695, %v2263_v34 }
 0xf09   : > { %4247 = vpow2.f32 %v2264_v35 }
 0xf0c   : > { %v2375_v36 = vpop.xlane.xlu0 %2374 }
 0xf0d   : > { %v2376_v10 = vsub.f32 %v2372_v17, %v2375_v36  ;;  %v4147_v17 = vld [vmem:[#allocation4 + $0x60] sm:$0xff]  }
 0xf0e   : > { %3884 = vmatpush3.bf16.msra.mxu0 %v4147_v17 }
 0xf0f   : > { %v2377_v37 = vmul.f32 1.442695, %v2376_v10  ;;  %3885 = vmatprep.subr.bf16.mxu0 %v4382_v0 }
 0xf11   : > { %4249 = vpow2.f32 %v2377_v37 }
 0xf12   : > { %3886 = vmatpush3.bf16.msra.mxu0 %v4148_v18 }
 0xf13   : > { %v4248_v38 = vpop.eup %4247  ;;  %3887 = vmatprep.subr.bf16.mxu0 %v4382_v0 }
 0xf14   : > { %v2487_v39 = vpop.xlane.xlu0 %2486  ;;  %v2266_v40 = vsel %vm823_vm8, %v4248_v38, 0.0 }
 0xf15   : > { %v2488_v41 = vsub.f32 %v2484_v27, %v2487_v39  ;;  %2267 = vadd.xlane.f32.xlu0 %v2266_v40  ;;  %v4150_v27 = vld [vmem:[#allocation4 + $0x78] sm:$0xff]  }
 0xf16   : > { %3888 = vmatpush3.bf16.msra.mxu0 %v4149_v19 }
 0xf17   : > { %v2489_v42 = vmul.f32 1.442695, %v2488_v41  ;;  %3889 = vmatprep.subr.bf16.mxu0 %v4382_v0  ;;  %v4151_v41 = vld [vmem:[%s5132_s6 + $0x100] ss:$16 sps:$4 sm:$0xff]  }
 0xf19   : > { %4251 = vpow2.f32 %v2489_v42  ;;  %v4153_v42 = vld [vmem:[%s5132_s6 + $0x104] ss:$16 sps:$4 sm:$0xff]  }
 0xf1a   : > { %3890 = vmatpush3.bf16.msra.mxu0 %v4150_v27 }
 0xf1b   : > { %v4250_v43 = vpop.eup %4249 }
 0xf1c   : > { %v2379_v44 = vsel %vm823_vm8, %v4250_v43, 0.0 }
 0xf1d   : > { %2380 = vadd.xlane.f32.xlu1 %v2379_v44  ;;  %v4156_v44 = vld [vmem:[%s5132_s6 + $0x10c] ss:$16 sps:$4 sm:$0xff]  }
 0xf1e   : > { %2918 = vmatprep.subr.bf16.mxu0 %v4156_v44 }
 0xf23   : > { %v4252_v45 = vpop.eup %4251 }
 0xf24   : > { %v2491_v46 = vsel %vm823_vm8, %v4252_v45, 0.0 }
 0xf25   : > { %2492 = vadd.xlane.f32.xlu0 %v2491_v46  ;;  %v4157_v46 = vld [vmem:[%s5132_s6 + $0x120] ss:$16 sps:$4 sm:$0xff]  }
 0xf2e   : > { %2497 = vrot.lane.b32.xlu1 %v4864_v26, %s5157_s15 }
 0xf30   : > { %v2156_v50 = vpop.xlane.xlu1 %2155 }
 0xf31   : > { %4253 = vrcp.f32 %v2156_v50  ;;  %v4160_v50 = vld [vmem:[%s5132_s6 + $0x128] ss:$16 sps:$4 sm:$0xff]  }
 0xf34   : > { %v2274_v49 = vpop.permute.xlu1 %2273 }
 0xf35   : > { %v2279_v52 = vsel %vm839_vm3, %v2274_v49, 0  ;;  %v4163_v49 = vld [vmem:[%s5132_s6 + $0x140] ss:$16 sps:$4 sm:$0xff]  }
 0xf3b   : > { %v4254_v47 = vpop.eup %4253  ;;  %2385 = vrot.lane.b32.xlu0 %v4864_v26, %s4389_s13 }
 0xf3c   : > { %v2158_v48 = vmul.f32 %v4254_v47, %v4246_v32  ;;  %v4165_v47 = vld [vmem:[%s5132_s6 + $0x144] ss:$16 sps:$4 sm:$0xff]  }
 0xf3e   : > { %v2159_v51 = vpack.c.bf16 %v2158_v48, %v2158_v48  ;;  %v4168_v48 = vld [vmem:[%s5132_s6 + $0x14c] ss:$16 sps:$4 sm:$0xff]  }
 0xf40   : > { %3836 = vmatmul.mubr.msk.bf16.vlgmr.msra.gmra.mrb[40].mxu1 %vm823_vm8, %v2159_v51  ;;  %v4166_v51 = vld [vmem:[%s5132_s6 + $0x148] ss:$16 sps:$4 sm:$0xff]  }
 0xf41   : > { %3846 = vmatpush3.bf16.msra.mxu1 %v2279_v52  ;;  %3847 = vmatprep.mubr.msk.bf16.mxu1 %vm4384_vm0, %v4382_v0 }
 0xf42   : > { %3857 = vmatprep.subr.bf16.mxu1 %v4382_v0 }
 0xfa2   : > { %v2268_v53 = vpop.xlane.xlu0 %2267 }
 0xfa3   : > { %4255 = vrcp.f32 %v2268_v53 }
 0xfaa   : > { %v2381_v55 = vpop.xlane.xlu1 %2380 }
 0xfab   : > { %4257 = vrcp.f32 %v2381_v55 }
 0xfad   : > { %v4256_v56 = vpop.eup %4255 }
 0xfae   : > { %v2270_v57 = vmul.f32 %v4256_v56, %v4248_v38  ;;  %v2498_v2 = vpop.permute.xlu1 %2497 }
 0xfaf   : > { %v2503_v4 = vsel %vm839_vm3, %v2498_v2, 0  ;;  %v4178_v2 = vld [vmem:[%s5132_s6 + $0x188] ss:$16 sps:$4 sm:$0xff]  }
 0xfb0   : > { %v2271_v26 = vpack.c.bf16 %v2270_v57, %v2270_v57 }
 0xfb2   : > { %3848 = vmatmul.mubr.msk.bf16.vlgmr.msra.gmra.mrb[44].mxu1 %vm823_vm8, %v2271_v26  ;;  %v2493_v59 = vpop.xlane.xlu0 %2492 }
 0xfb3   : > { %4259 = vrcp.f32 %v2493_v59  ;;  %3859 = vmatprep.mubr.msk.bf16.mxu1 %vm4384_vm0, %v4382_v0  ;;  %v4171_v59 = vld [vmem:[%s5132_s6 + $0x164] ss:$16 sps:$4 sm:$0xff]  }
 0xfb5   : > { %v4258_v60 = vpop.eup %4257 }
 0xfb6   : > { %v2383_v61 = vmul.f32 %v4258_v60, %v4250_v43  ;;  %v2386_v62 = vpop.permute.xlu0 %2385  ;;  %v4154_v43 = vld [vmem:[%s5132_s6 + $0x108] ss:$16 sps:$4 sm:$0xff]   ;;  %v4174_v60 = vld [vmem:[%s5132_s6 + $0x16c] ss:$16 sps:$4 sm:$0xff]  }
 0xfb7   : > { %v2391_v1 = vsel %vm839_vm3, %v2386_v62, 0  ;;  %v4175_v62 = vld [vmem:[%s5132_s6 + $0x180] ss:$16 sps:$4 sm:$0xff]  }
 0xfb8   : > { %3858 = vmatpush3.bf16.msra.mxu1 %v2391_v1  ;;  %v2384_v3 = vpack.c.bf16 %v2383_v61, %v2383_v61  ;;  %v4172_v61 = vld [vmem:[%s5132_s6 + $0x168] ss:$16 sps:$4 sm:$0xff]   ;;  %v4177_v1 = vld [vmem:[%s5132_s6 + $0x184] ss:$16 sps:$4 sm:$0xff]  }
 0xfb9   : > { %3869 = vmatprep.subr.bf16.mxu1 %v4382_v0 }
 0xfbb   : > { %3860 = vmatmul.mubr.msk.bf16.vlgmr.msra.gmra.mrb[48].mxu1 %vm823_vm8, %v2384_v3  ;;  %v4180_v3 = vld [vmem:[%s5132_s6 + $0x18c] ss:$16 sps:$4 sm:$0xff]  }
 0xfbc   : > { %3870 = vmatpush3.bf16.msra.mxu1 %v2503_v4  ;;  %3871 = vmatprep.mubr.msk.bf16.mxu1 %vm4384_vm0, %v4382_v0  ;;  %v4183_v4 = vld [vmem:[%s5132_s6 + $0x1a4] ss:$16 sps:$4 sm:$0xff]  }
 0xfbd   : > { %v4260_v25 = vpop.eup %4259  ;;  %2877 = vmatprep.subr.bf16.mxu1 %v4153_v42 }
 0xfbe   : > { %v2495_v7 = vmul.f32 %v4260_v25, %v4252_v45  ;;  %v4162_v45 = vld [vmem:[%s5132_s6 + $0x12c] ss:$16 sps:$4 sm:$0xff]  }
 0xfbf   : > { %v4186_v25 = vld [vmem:[%s5132_s6 + $0x1ac] ss:$16 sps:$4 sm:$0xff]  }
 0xfc0   : > { %v2496_v8 = vpack.c.bf16 %v2495_v7, %v2495_v7  ;;  %v4181_v7 = vld [vmem:[%s5132_s6 + $0x1a0] ss:$16 sps:$4 sm:$0xff]  }
 0xfc3   : > { %3872 = vmatmul.mubr.msk.bf16.vlgmr.msra.gmra.mrb[52].mxu1 %vm823_vm8, %v2496_v8  ;;  %v4184_v8 = vld [vmem:[%s5132_s6 + $0x1a8] ss:$16 sps:$4 sm:$0xff]  }
 0xfc4   : > { %2909 = vmatprep.mubr.bf16.mxu1 %v4383_v24  ;;  %2878 = vmatpush1.bf16.msra.mxu1 %v4151_v41  ;;  %v4214_v41 = vld [vmem:[#allocation6 + $0xb8] sm:$0xff]  }
0x1013   : > { %v2200_v9 = vpop.f32.mrb[40].mxu1 }
0x1014   : > { %v3837_v11 = vpop.f32.mrb[41].mxu1 }
0x1015   : > { %v2203_v12 = vpop.f32.mrb[42].mxu1  ;;  %v4192_v11 = vld [vmem:[%s5132_s6 + $0x1cc] ss:$16 sps:$4 sm:$0xff]  }
0x1016   : > { %v3838_v54 = vpop.f32.mrb[43].mxu1  ;;  %v4187_v12 = vld [vmem:[%s5132_s6 + $0x1c0] ss:$16 sps:$4 sm:$0xff]  }
0x1017   : > { %v4190_v54 = vld [vmem:[%s5132_s6 + $0x1c8] ss:$16 sps:$4 sm:$0xff]  }
0x1085   : > { %v2315_v20 = vpop.f32.mrb[44].mxu1 }
0x1086   : > { %2546 = vrot.lane.b32.xlu1 %v2315_v20, %s5157_s15  ;;  %v3849_v21 = vpop.f32.mrb[45].mxu1 }
0x1087   : > { %v2318_v22 = vpop.f32.mrb[46].mxu1  ;;  %v3503_v21 = vld [vmem:[%s5131_s5 + $0x1] ss:$0 sm:$0xff] }
0x1088   : > { %v3850_v23 = vpop.f32.mrb[47].mxu1 }
0x108e   : > { %v2427_v28 = vpop.f32.mrb[48].mxu1 }
0x108f   : > { %2550 = vrot.lane.b32.xlu0 %v2427_v28, %s4389_s13  ;;  %v3861_v29 = vpop.f32.mrb[49].mxu1  ;;  %v4199_v28 = vld [vmem:[#allocation6 + $0xc0] sm:$0xff]  }
0x1090   : > { %v2430_v30 = vpop.f32.mrb[50].mxu1  ;;  %v4200_v29 = vld [vmem:[#allocation6 + $0x80] sm:$0xff]  }
0x1091   : > { %v3862_v31 = vpop.f32.mrb[51].mxu1  ;;  %v4201_v30 = vld [vmem:[#allocation6 + $0xc8] sm:$0xff]  }
0x1092   : > { %v4202_v31 = vld [vmem:[#allocation6 + $0x88] sm:$0xff]  }
0x1096   : > { %v2539_v32 = vpop.f32.mrb[52].mxu1 }
0x1097   : > { %2554 = vrot.lane.b32.xlu1 %v2539_v32, %s4388_s26  ;;  %v3873_v33 = vpop.f32.mrb[53].mxu1  ;;  %v4203_v32 = vld [vmem:[#allocation6 + $0xd0] sm:$0xff]  }
0x1098   : > { %v2542_v63 = vpop.f32.mrb[54].mxu1  ;;  %v4204_v33 = vld [vmem:[#allocation6 + $0x90] sm:$0xff]  }
0x1099   : > { %v3874_v34 = vpop.f32.mrb[55].mxu1  ;;  %v4205_v63 = vld [vmem:[#allocation6 + $0xd8] sm:$0xff]  }
0x109a   : > { %v4206_v34 = vld [vmem:[#allocation6 + $0x98] sm:$0xff]  }
0x10f8   : > { %v2547_v35 = vpop.permute.xlu1 %2546 }
0x10f9   : > { %v2557_v10 = vsel %vm774_vm2, %v2200_v9, %v2547_v35  ;;  %v4189_v9 = vld [vmem:[%s5132_s6 + $0x1c4] ss:$16 sps:$4 sm:$0xff]  }
0x10fa   : > { %v4207_v35 = vld [vmem:[#allocation6 + $0xe0] sm:$0xff]  }
0x1101   : > { %v2551_v36 = vpop.permute.xlu0 %2550 }
0x1102   : > { %v2558_v37 = vsel %vm1235_vm9, %v2557_v10, %v2551_v36  ;;  %v4208_v36 = vld [vmem:[#allocation6 + $0xa0] sm:$0xff]   ;;  %v4209_v10 = vld [vmem:[#allocation6 + $0xe8] sm:$0xff]  }
0x1109   : > { %v2555_v38 = vpop.permute.xlu1 %2554 }
0x110a   : > { %v2559_v39 = vsel %vm1237_vm10, %v2558_v37, %v2555_v38  ;;  %v4210_v37 = vld [vmem:[#allocation6 + $0xa8] sm:$0xff]   ;;  %v4211_v38 = vld [vmem:[#allocation6 + $0xf0] sm:$0xff]  }
0x110b   : > { %v2560_v40 = vpack.c.bf16 %v2559_v39, %v2559_v39  ;;  %v4212_v39 = vld [vmem:[#allocation6 + $0xb0] sm:$0xff]  }
0x110d   : > { %3892 = vmatmul.mubr.bf16.vlgmr.msra.gmra.mrb[40].mxu0 %v2560_v40  ;;  %v4213_v40 = vld [vmem:[#allocation6 + $0xf8] sm:$0xff]  }
0x110e   : > { %2950 = vmatprep.mubr.bf16.mxu0 %v4383_v24  ;;  %v4159_v24 = vld [vmem:[%s5132_s6 + $0x124] ss:$16 sps:$4 sm:$0xff]   ;;  %2919 = vmatpush1.bf16.msra.mxu0 %v4154_v43 }
0x110f   : > { %2879 = vmatprep.subr.bf16.mxu1 %v4159_v24  ;;  %2920 = vmatprep.subr.bf16.mxu0 %v4162_v45 }
0x1110   : > { %2880 = vmatpush1.bf16.msra.mxu1 %v4157_v46 }
0x1111   : > { %2881 = vmatprep.subr.bf16.mxu1 %v4165_v47 }
0x1112   : > { %2921 = vmatpush1.bf16.msra.mxu0 %v4160_v50 }
0x1113   : > { %2922 = vmatprep.subr.bf16.mxu0 %v4168_v48 }
0x1114   : > { %2882 = vmatpush1.bf16.msra.mxu1 %v4163_v49 }
0x1115   : > { %2883 = vmatprep.subr.bf16.mxu1 %v4171_v59 }
0x1116   : > { %2923 = vmatpush1.bf16.msra.mxu0 %v4166_v51 }
0x1117   : > { %2924 = vmatprep.subr.bf16.mxu0 %v4174_v60 }
0x111a   : > { %2925 = vmatpush1.bf16.msra.mxu0 %v4172_v61 }
0x111b   : > { %2926 = vmatprep.subr.bf16.mxu0 %v4180_v3 }
0x111e   : > { %2927 = vmatpush1.bf16.msra.mxu0 %v4178_v2  ;;  %v4274_v2 = vld [vmem:[%s4649_s27] sm:$0x1] }
0x111f   : > { %2928 = vmatprep.subr.bf16.mxu0 %v4186_v25  ;;  %v3163_v3 = vsel %vm3162_vm11, %v4274_v2, 0.0 }
0x1122   : > { %2929 = vmatpush1.bf16.msra.mxu0 %v4184_v8 }
0x1123   : > { %2930 = vmatprep.subr.bf16.mxu0 %v4192_v11 }
0x1126   : > { %2931 = vmatpush1.bf16.msra.mxu0 %v4190_v54  ;;  %v3181_v54 = vld [vmem:[%s5135_s9] sm:$0xff] }
0x1127   : > { %2932 = vmatprep.subr.bf16.mxu0 %v4198_v14 }
0x112a   : > { %2933 = vmatpush1.bf16.msra.mxu0 %v4196_v16  ;;  %v3183_v16 = vld [vmem:[%s5135_s9 + $0x10] sm:$0xff] }
0x11e0   : > { %v2660_v52 = vpop.f32.mrb[40].mxu0 }
0x11e1   : > { %v4992_v53 = vadd.f32 %v2660_v52, %v4846_v58  ;;  %v3893_v55 = vpop.f32.mrb[41].mxu0  ;;  %v4169_v58 = vld [vmem:[%s5132_s6 + $0x160] ss:$16 sps:$4 sm:$0xff]  }
0x11e2   : > { %v2663_v56 = vpop.f32.mrb[42].mxu0  ;;  %2884 = vmatpush1.bf16.msra.mxu1 %v4169_v58 }
0x11e3   : > { %v3894_v57 = vpop.f32.mrb[43].mxu0  ;;  %v2669_v26 = vmul.f32 %v4992_v53, %v4992_v53  ;;  %2885 = vmatprep.subr.bf16.mxu1 %v4177_v1 }
0x11e5   : > { %2670 = vadd.xlane.f32.xlu0 %v2669_v26 }
0x11e6   : > { %2886 = vmatpush1.bf16.msra.mxu1 %v4175_v62 }
0x11e7   : > { %2887 = vmatprep.subr.bf16.mxu1 %v4183_v4 }
0x11e9   : > { %3164 = vadd.xlane.f32.xlu0 %v3163_v3 }
0x11ea   : > { %2888 = vmatpush1.bf16.msra.mxu1 %v4181_v7 }
0x11eb   : > { %2889 = vmatprep.subr.bf16.mxu1 %v4189_v9 }
0x11ee   : > { %2890 = vmatpush1.bf16.msra.mxu1 %v4187_v12 }
0x11ef   : > { %2891 = vmatprep.subr.bf16.mxu1 %v4195_v13  ;;  %v3182_v13 = vld [vmem:[%s5135_s9 + $0x8] sm:$0xff] }
0x11f0   : > { %v3931_v14 = vpack.c.bf16 %v3182_v13, %v3181_v54 }
0x11f2   : > { %2892 = vmatpush1.bf16.msra.mxu1 %v4193_v15  ;;  %v4391_v15 = vmov 0.0|0.0  }
0x11f3   : > { %3680 = vmatprep.subr.bf16.mxu1 %v4199_v28  ;;  %3930 = vmatprep.subr.bf16.mxu0 %v4391_v15  ;;  %v3190_v28 = vld [vmem:[%s5135_s9 + $0x48] sm:$0xff] }
0x1272   : > { %v2671_v17 = vpop.xlane.xlu0 %2670 }
0x1273   : > { %v2672_v18 = vmul.f32 0.0078125, %v2671_v17 }
0x1275   : > { %v2673_v19 = vadd.f32 1e-05, %v2672_v18  ;;  %v3185_v18 = vld [vmem:[%s5135_s9 + $0x20] sm:$0xff] }
0x1277   : > { %4261 = vrsqrt.f32 %v2673_v19  ;;  %v3186_v19 = vld [vmem:[%s5135_s9 + $0x28] sm:$0xff] }
0x1281   : > { %v4262_v20 = vpop.eup %4261 }
0x1282   : > { %v2675_v22 = vmul.f32 %v4262_v20, %v4992_v53  ;;  %v3937_v20 = vpack.c.bf16 %v3186_v19, %v3185_v18 }
0x1284   : > { %v2682_v23 = vmul.f32 %v3503_v21, %v2675_v22  ;;  %v3187_v21 = vld [vmem:[%s5135_s9 + $0x30] sm:$0xff]  ;;  %v3188_v22 = vld [vmem:[%s5135_s9 + $0x38] sm:$0xff] }
0x1286   : > { %v2683_v27 = vpack.c.bf16 %v2682_v23, %v2682_v23  ;;  %v3940_v23 = vpack.c.bf16 %v3188_v22, %v3187_v21 }
0x1288   : > { %2910 = vmatmul.mubr.bf16.vlgmr.msra.gmra.mrb[56].mxu1 %v2683_v27  ;;  %2951 = vmatmul.mubr.bf16.vlgmr.msra.gmra.mrb[44].mxu0 %v2683_v27  ;;  %v3189_v27 = vld [vmem:[%s5135_s9 + $0x40] sm:$0xff] }
0x1289   : > { %3927 = vmatprep.mubr.msk.f32.mxu0 %vm4384_vm0, %v4382_v0  ;;  %3681 = vmatpush3.bf16.msra.mxu1 %v4200_v29  ;;  %v3943_v29 = vpack.c.bf16 %v3190_v28, %v3189_v27 }
0x128a   : > { %3682 = vmatprep.subr.bf16.mxu1 %v4201_v30  ;;  %3932 = vmatpush3.bf16.msra.mxu0 %v3931_v14  ;;  %v3191_v30 = vld [vmem:[%s5135_s9 + $0x50] sm:$0xff] }
0x128b   : > { %3933 = vmatprep.subr.bf16.mxu0 %v4391_v15 }
0x128d   : > { %3683 = vmatpush3.bf16.msra.mxu1 %v4202_v31  ;;  %v3192_v31 = vld [vmem:[%s5135_s9 + $0x58] sm:$0xff] }
0x128e   : > { %3684 = vmatprep.subr.bf16.mxu1 %v4203_v32  ;;  %v3946_v32 = vpack.c.bf16 %v3192_v31, %v3191_v30 }
0x1291   : > { %3685 = vmatpush3.bf16.msra.mxu1 %v4204_v33  ;;  %v3193_v33 = vld [vmem:[%s5135_s9 + $0x60] sm:$0xff] }
0x1292   : > { %3686 = vmatprep.subr.bf16.mxu1 %v4205_v63  ;;  %v3194_v63 = vld [vmem:[%s5135_s9 + $0x68] sm:$0xff] }
0x1295   : > { %3687 = vmatpush3.bf16.msra.mxu1 %v4206_v34  ;;  %v3195_v34 = vld [vmem:[%s5135_s9 + $0x70] sm:$0xff] }
0x1296   : > { %3688 = vmatprep.subr.bf16.mxu1 %v4207_v35  ;;  %v3949_v35 = vpack.c.bf16 %v3194_v63, %v3193_v33 }
0x1299   : > { %3689 = vmatpush3.bf16.msra.mxu1 %v4208_v36  ;;  %v3196_v36 = vld [vmem:[%s5135_s9 + $0x78] sm:$0xff] }
0x129a   : > { %3690 = vmatprep.subr.bf16.mxu1 %v4209_v10  ;;  %v3952_v10 = vpack.c.bf16 %v3196_v36, %v3195_v34 }
0x129d   : > { %3691 = vmatpush3.bf16.msra.mxu1 %v4210_v37 }
0x129e   : > { %3692 = vmatprep.subr.bf16.mxu1 %v4211_v38 }
0x12a1   : > { %3693 = vmatpush3.bf16.msra.mxu1 %v4212_v39 }
0x12a2   : > { %3694 = vmatprep.subr.bf16.mxu1 %v4213_v40  ;;  %v3165_v40 = vpop.xlane.xlu0 %3164 }
0x12a5   : > { %3695 = vmatpush3.bf16.msra.mxu1 %v4214_v41  ;;  %v3587_v41 = vadd.f32 -1.0, %v3165_v40 }
0x135b   : > { %v2911_v42 = vpop.f32.mrb[56].mxu1  ;;  %v2952_v43 = vpop.f32.mrb[44].mxu0 }
0x135c   : > { %v3568_v44 = vmul.f32 -1.442695, %v2911_v42  ;;  %v2913_v24 = vpop.f32.mrb[57].mxu1  ;;  %v2954_v45 = vpop.f32.mrb[45].mxu0 }
0x135d   : > { %v3569_v46 = vmul.f32 -1.442695, %v2913_v24  ;;  %v2915_v50 = vpop.f32.mrb[58].mxu1  ;;  %v2956_v47 = vpop.f32.mrb[46].mxu0 }
0x135e   : > { %4263 = vpow2.f32 %v3568_v44  ;;  %v2916_v48 = vpop.f32.mrb[59].mxu1  ;;  %v2957_v49 = vpop.f32.mrb[47].mxu0 }
0x135f   : > { %4265 = vpow2.f32 %v3569_v46 }
0x1368   : > { %v4264_v51 = vpop.eup %4263 }
0x1369   : > { %v4266_v52 = vpop.eup %4265  ;;  %v2965_v55 = vadd.f32 1.0, %v4264_v51 }
0x136a   : > { %v2966_v56 = vadd.f32 1.0, %v4266_v52 }
0x136b   : > { %4267 = vrcp.f32 %v2965_v55 }
0x136c   : > { %4269 = vrcp.f32 %v2966_v56 }
0x1375   : > { %v4268_v57 = vpop.eup %4267 }
0x1376   : > { %v4270_v26 = vpop.eup %4269  ;;  %v2971_v59 = vmul.f32 %v4268_v57, %v2911_v42  ;;  %v3167_v42 = vcvt.s32.f32 %v4652_v5 }
0x1377   : > { %v2972_v60 = vmul.f32 %v4270_v26, %v2913_v24  ;;  %v3586_v24 = vld [vmem:[%s5134_s8] ss:$0 sm:$0xff] }
0x1378   : > { %v2973_v58 = vmul.f32 %v2971_v59, %v2952_v43  ;;  %v3171_v43 = vrot.slane %v3587_v41, %v477_v6 }
0x1379   : > { %v2974_v61 = vmul.f32 %v2972_v60, %v2954_v45 }
0x137a   : > { %v2975_v1 = vpack.c.bf16 %v2973_v58, %v2973_v58  ;;  %vm3172_vm12 = vcmp.eq.f32.partialorder %v3167_v42, %v3171_v43 }
0x137b   : > { %v2976_v62 = vpack.c.bf16 %v2974_v61, %v2974_v61  ;;  %v3173_v46 = vsel %vm3172_vm12, 1.0, %v4382_v0 }
0x137d   : > { %3138 = vmatprep.mubr.bf16.mxu1 %v2976_v62 }
0x137e   : > { %3139 = vmatmul.mubr.bf16.vlgmr.msra.gmra.mrb[60].mxu1 %v2975_v1 }
0x1451   : > { %v3696_v4 = vpop.f32.mrb[60].mxu1 }
0x1452   : > { %v3697_v25 = vpop.f32.mrb[61].mxu1 }
0x1453   : > { %v3698_v7 = vadd.f32 %v3697_v25, %v3696_v4  ;;  %v3699_v8 = vpop.f32.mrb[62].mxu1 }
0x1454   : > { %v3700_v9 = vpop.f32.mrb[63].mxu1 }
0x1455   : > { %v3146_v11 = vadd.f32 %v3698_v7, %v4992_v53  ;;  %v3184_v53 = vld [vmem:[%s5135_s9 + $0x18] sm:$0xff] }
0x1456   : > { %v3934_v17 = vpack.c.bf16 %v3184_v53, %v3183_v16 }
0x1457   : > { %v3148_v12 = vmul.f32 %v3146_v11, %v3146_v11 }
0x1458   : > { %3935 = vmatpush3.bf16.msra.mxu0 %v3934_v17 }
0x1459   : > { %3149 = vadd.xlane.f32.xlu1 %v3148_v12  ;;  %3936 = vmatprep.subr.bf16.mxu0 %v4391_v15 }
0x145c   : > { %3938 = vmatpush3.bf16.msra.mxu0 %v3937_v20 }
0x145d   : > { %3939 = vmatprep.subr.bf16.mxu0 %v4391_v15 }
0x1460   : > { %3941 = vmatpush3.bf16.msra.mxu0 %v3940_v23 }
0x1461   : > { %3942 = vmatprep.subr.bf16.mxu0 %v4391_v15 }
0x1464   : > { %3944 = vmatpush3.bf16.msra.mxu0 %v3943_v29 }
0x1465   : > { %3945 = vmatprep.subr.bf16.mxu0 %v4391_v15 }
0x1468   : > { %3947 = vmatpush3.bf16.msra.mxu0 %v3946_v32 }
0x1469   : > { %3948 = vmatprep.subr.bf16.mxu0 %v4391_v15 }
0x146c   : > { %3950 = vmatpush3.bf16.msra.mxu0 %v3949_v35 }
0x146d   : > { %3951 = vmatprep.subr.bf16.mxu0 %v4391_v15 }
0x1470   : > { %3953 = vmatpush3.bf16.msra.mxu0 %v3952_v10 }
0x14e6   : > { %v3150_v37 = vpop.xlane.xlu1 %3149 }
0x14e7   : > { %v3151_v38 = vmul.f32 0.0078125, %v3150_v37 }
0x14e9   : > { %v3152_v39 = vadd.f32 1e-05, %v3151_v38 }
0x14eb   : > { %4271 = vrsqrt.f32 %v3152_v39 }
0x14f5   : > { %v4272_v44 = vpop.eup %4271 }
0x14f6   : > { %v3154_v45 = vmul.f32 %v4272_v44, %v3146_v11 }
0x14f8   : > { %v3161_v50 = vmul.f32 %v3586_v24, %v3154_v45 }
0x14fa   : > { %v3174_v47 = vmul.f32 %v3173_v46, %v3161_v50 }
0x14fc   : > { %v3175_v48 = vrot.slane %v3174_v47, 4 }
0x14fe   : > { %v3176_v49 = vadd.f32 %v3175_v48, %v3174_v47 }
0x1500   : > { %v3177_v51 = vrot.slane %v3176_v49, 2 }
0x1502   : > { %v3178_v52 = vadd.f32 %v3177_v51, %v3176_v49 }
0x1504   : > { %v3179_v55 = vrot.slane %v3178_v52, 1 }
0x1506   : > { %v3180_v56 = vadd.f32 %v3179_v55, %v3178_v52 }
0x1508   : > { %3928 = vmatmul.mubr.f32.vlgmr.msra.gmra.mrb[48].mxu0 %v3180_v56 }
0x15db   : > { %v3263_v5 = vpop.f32.mrb[48].mxu0 }
0x15dc   : > { %3268 = vst.msk [vmem:[%s464_s14] sm:$0x1] %vm3267_vm13, %v3263_v5  ;;  %v3929_v6 = vpop.f32.mrb[49].mxu0 }
0x15dd PF: > { %s5158_s28 = sld [smem:[#allocation9_spill]] }
0x15e3   : > { %s24_s21 = sadd.s32 1, %s5158_s28  }
0x15e4   : > { %p21_p5 = scmp.ge.s32.totalorder %s24_s21, 4  }
0x15e6   :  { %23 = sbr.rel (!%p21_p5) target bundleno = 2 (0x2), region = 120 }
0x15ed   :  { %3286 = vsyncpa [#allocation3], 1 }
0x15ee   :  { %3288 = vsyncpa [#allocation3 + $0x1], 1 }
0x15ef   :  { %3289 = vsyncpa [#allocation5], 1 }

</bundles_post_ra>
